<compile_context>
chip_gen: v7x
topology: tpu7x:2x2x1
jax: 0.10.0
libtpu: 0.0.40
codegen_flags: <defaults>
</compile_context>

<pallas_src>
import functools

import numpy as np
import jax
import jax.numpy as jnp
from jax import lax
from jax.experimental import pallas as pl
from jax.experimental.pallas import tpu as pltpu


def _round_up(a, b):
    return ((a + b - 1) // b) * b


def _hash_bits(shape, salt):
    """Counter-based 32-bit hash (lowbias32) -> uint32 bits. Backend-agnostic."""
    row = lax.broadcasted_iota(jnp.uint32, shape, 0)
    col = lax.broadcasted_iota(jnp.uint32, shape, 1)
    x = row * jnp.uint32(0x9E3779B1) + col * jnp.uint32(0x85EBCA77) + salt
    x = x ^ (x >> jnp.uint32(16))
    x = x * jnp.uint32(0x7FEB352D)
    x = x ^ (x >> jnp.uint32(15))
    x = x * jnp.uint32(0x846CA68B)
    x = x ^ (x >> jnp.uint32(16))
    return x


def _dropout(h, keep_prob, salt):
    """Inverted dropout via integer-threshold compare (no uint->float convert)."""
    thresh = jnp.uint32(min(int(keep_prob * (1 << 32)), (1 << 32) - 1))
    bits = _hash_bits(h.shape, salt)
    return jnp.where(bits < thresh, h * (1.0 / keep_prob), 0.0)


def ffn_sublayer_kernel(seed_ref, x_ref, g_ref, beta_ref, w1_ref, b1_ref,
                        w2_ref, b2_ref, o_ref, *, keep_prob, eps):
    x = x_ref[...].astype(jnp.float32)                      # (TM, D)
    d = x.shape[-1]

    # --- LayerNorm (PyTorch semantics: unbiased std, eps added to std) ---
    mean = jnp.mean(x, axis=-1, keepdims=True)
    xc = x - mean
    var = jnp.sum(xc * xc, axis=-1, keepdims=True) / (d - 1.0)
    std = jnp.sqrt(var)
    ln = g_ref[...] * (xc / (std + eps)) + beta_ref[...]

    use_dropout = keep_prob < 1.0
    if use_dropout:
        pid = pl.program_id(0).astype(jnp.uint32)
        salt = seed_ref[0].astype(jnp.uint32) + pid * jnp.uint32(0x9E3779B1)

    # --- Linear 1 (bf16 MXU inputs, f32 accumulation) + bias + ReLU ---
    h = jnp.dot(ln.astype(jnp.bfloat16), w1_ref[...],
                preferred_element_type=jnp.float32)
    h = jnp.maximum(h + b1_ref[...], 0.0)
    if use_dropout:                                          # dropout inside FFN
        h = _dropout(h, keep_prob, salt + jnp.uint32(0x243F6A88))

    # --- Linear 2 (bf16 MXU inputs, f32 accumulation) + bias ---
    y = jnp.dot(h.astype(jnp.bfloat16), w2_ref[...],
                preferred_element_type=jnp.float32)
    y = y + b2_ref[...]
    if use_dropout:                                          # residual-branch dropout
        y = _dropout(y, keep_prob, salt + jnp.uint32(0x13198A2E))

    # --- residual add ---
    o_ref[...] = (x + y).astype(o_ref.dtype)


def transformer_ffn_sublayer(x, params, *, dropout=0.1, training=False, seed=0,
                             tile_m=256, eps=1e-6):
    """x: (..., n_units). Computes x + Dropout(FFN(LayerNorm(x))). n_units % 128 == 0."""
    gamma, beta, w1, b1, w2, b2 = params
    orig_shape = x.shape
    d = orig_shape[-1]
    if d % 128 != 0:
        raise ValueError("n_units must be a multiple of 128 (lane-dense layout).")
    hidden = w1.shape[1]

    M = int(np.prod(orig_shape[:-1]))
    xf = x.reshape(M, d)

    # Row tile: multiple of 8, capped at tile_m; pad rows so the grid divides evenly.
    tm = min(tile_m, _round_up(M, 8))
    m_pad = _round_up(M, tm)
    if m_pad != M:
        xf = jnp.pad(xf, ((0, m_pad - M), (0, 0)))
    grid = (m_pad // tm,)

    keep_prob = float(1.0 - dropout) if training else 1.0
    kernel = functools.partial(ffn_sublayer_kernel, keep_prob=keep_prob, eps=eps)

    # VMEM budget: double-buffered x/out tiles + resident weights (x2 for buffers)
    # + f32 intermediates, with headroom; capped well under v7x's 64 MiB.
    itemsize = xf.dtype.itemsize
    vmem_need = (4 * tm * d * itemsize
                 + 2 * (w1.size * w1.dtype.itemsize + w2.size * w2.dtype.itemsize)
                 + 2 * 4 * (b1.size + b2.size + gamma.size + beta.size)
                 + 2 * tm * hidden * 4)
    vmem_limit = int(min(max(vmem_need + (4 << 20), 16 << 20), 48 << 20))

    cost = pl.CostEstimate(
        flops=int(2 * m_pad * hidden * 2 * d),
        transcendentals=0,
        bytes_accessed=int(2 * m_pad * d * itemsize
                           + w1.size * w1.dtype.itemsize
                           + w2.size * w2.dtype.itemsize),
    )

    out = pl.pallas_call(
        kernel,
        out_shape=jax.ShapeDtypeStruct((m_pad, d), x.dtype),
        grid_spec=pltpu.PrefetchScalarGridSpec(
            num_scalar_prefetch=1,                    # dropout seed lives in SMEM
            grid=grid,
            in_specs=[
                pl.BlockSpec((tm, d), lambda i, s: (i, 0)),       # x tile
                pl.BlockSpec((1, d), lambda i, s: (0, 0)),        # LN gamma
                pl.BlockSpec((1, d), lambda i, s: (0, 0)),        # LN beta
                pl.BlockSpec((d, hidden), lambda i, s: (0, 0)),   # w1 (resident)
                pl.BlockSpec((1, hidden), lambda i, s: (0, 0)),   # b1
                pl.BlockSpec((hidden, d), lambda i, s: (0, 0)),   # w2 (resident)
                pl.BlockSpec((1, d), lambda i, s: (0, 0)),        # b2
            ],
            out_specs=pl.BlockSpec((tm, d), lambda i, s: (i, 0)),
        ),
        compiler_params=pltpu.CompilerParams(
            dimension_semantics=("parallel",),        # independent row tiles
            vmem_limit_bytes=vmem_limit,
        ),
        cost_estimate=cost,
    )(jnp.array([seed], dtype=jnp.int32), xf, gamma, beta, w1, b1, w2, b2)

    if m_pad != M:
        out = out[:M]
    return out.reshape(orig_shape)


def init_params(key, n_units, hidden=2048):
    """LayerNorm(ones/zeros) + nn.Linear-style U(-1/sqrt(fan_in), 1/sqrt(fan_in)).

    Weights are stored (in, out) (transposed vs. PyTorch) and in bf16 for the MXU."""
    k1, k2, k3, k4 = jax.random.split(key, 4)
    bound1 = 1.0 / np.sqrt(n_units)
    bound2 = 1.0 / np.sqrt(hidden)
    gamma = jnp.ones((1, n_units), jnp.float32)
    beta = jnp.zeros((1, n_units), jnp.float32)
    w1 = jax.random.uniform(k1, (n_units, hidden), jnp.float32, -bound1, bound1
                            ).astype(jnp.bfloat16)
    b1 = jax.random.uniform(k2, (1, hidden), jnp.float32, -bound1, bound1)
    w2 = jax.random.uniform(k3, (hidden, n_units), jnp.float32, -bound2, bound2
                            ).astype(jnp.bfloat16)
    b2 = jax.random.uniform(k4, (1, n_units), jnp.float32, -bound2, bound2)
    return gamma, beta, w1, b1, w2, b2


def reference_eval(x, params, eps=1e-6):
    """Pure-JAX eval-mode reference with identical dtype handling."""
    gamma, beta, w1, b1, w2, b2 = params
    d = x.shape[-1]
    xf = x.reshape(-1, d).astype(jnp.float32)
    mean = xf.mean(-1, keepdims=True)
    xc = xf - mean
    var = (xc * xc).sum(-1, keepdims=True) / (d - 1.0)
    ln = gamma * (xc / (jnp.sqrt(var) + eps)) + beta
    h = jnp.dot(ln.astype(jnp.bfloat16), w1, preferred_element_type=jnp.float32)
    h = jnp.maximum(h + b1, 0.0)
    y = jnp.dot(h.astype(jnp.bfloat16), w2, preferred_element_type=jnp.float32) + b2
    return (xf + y).reshape(x.shape).astype(x.dtype)


if __name__ == "__main__":
    key = jax.random.PRNGKey(0)
    kx, kp = jax.random.split(key)

    batch, seq, n_units, hidden = 2, 8, 128, 2048   # n_units lane-dense (128)
    x = jax.random.normal(kx, (batch, seq, n_units), dtype=jnp.float32)
    params = init_params(kp, n_units, hidden)

    # Eval mode (dropout = identity): check against pure-JAX reference.
    out = transformer_ffn_sublayer(x, params, dropout=0.1, training=False)
    out = jax.block_until_ready(out)
    ref = reference_eval(x, params)
    assert out.shape == x.shape and out.dtype == x.dtype
    np.testing.assert_allclose(np.asarray(out), np.asarray(ref), rtol=2e-2, atol=2e-2)

    # Training mode: fused in-kernel dropout (hash-based, per-tile salted).
    out_train = transformer_ffn_sublayer(x, params, dropout=0.1, training=True,
                                         seed=1234)
    out_train = jax.block_until_ready(out_train)
    assert np.isfinite(np.asarray(out_train)).all()

    print("KERNEL_OK")
</pallas_src>

<mosaic_0001>
module attributes {stable_mosaic.version = 11 : i64} {
  func.func @ffn_sublayer_kernel(%arg0: i32, %arg1: memref<1xi32, #tpu.memory_space<smem>>, %arg2: memref<16x128xf32, #tpu.memory_space<vmem>>, %arg3: memref<1x128xf32, #tpu.memory_space<vmem>>, %arg4: memref<1x128xf32, #tpu.memory_space<vmem>>, %arg5: memref<128x2048xbf16, #tpu.memory_space<vmem>>, %arg6: memref<1x2048xf32, #tpu.memory_space<vmem>>, %arg7: memref<2048x128xbf16, #tpu.memory_space<vmem>>, %arg8: memref<1x128xf32, #tpu.memory_space<vmem>>, %arg9: memref<16x128xf32, #tpu.memory_space<vmem>>) attributes {dimension_semantics = [#tpu.dimension_semantics<parallel>], iteration_bounds = array<i64: 1>, scalar_prefetch = 1 : i64, scratch_operands = 0 : i64, tpu.core_type = #tpu.core_type<tc>, window_params = [{transform_indices = @transform_0, window_bounds = array<i64: 16, 128>}, {pipeline_mode = #tpu.pipeline_mode<synchronous>, transform_indices = @transform_1, window_bounds = array<i64: 1, 128>}, {pipeline_mode = #tpu.pipeline_mode<synchronous>, transform_indices = @transform_2, window_bounds = array<i64: 1, 128>}, {pipeline_mode = #tpu.pipeline_mode<synchronous>, transform_indices = @transform_3, window_bounds = array<i64: 128, 2048>}, {pipeline_mode = #tpu.pipeline_mode<synchronous>, transform_indices = @transform_4, window_bounds = array<i64: 1, 2048>}, {pipeline_mode = #tpu.pipeline_mode<synchronous>, transform_indices = @transform_5, window_bounds = array<i64: 2048, 128>}, {pipeline_mode = #tpu.pipeline_mode<synchronous>, transform_indices = @transform_6, window_bounds = array<i64: 1, 128>}, {transform_indices = @transform_7, window_bounds = array<i64: 16, 128>}]} {
    %c0 = arith.constant 0 : index
    %c0_0 = arith.constant 0 : index
    %0 = vector.load %arg2[%c0, %c0_0] : memref<16x128xf32, #tpu.memory_space<vmem>>, vector<16x128xf32>
    %cst = arith.constant dense<0.000000e+00> : vector<16xf32>
    %1 = vector.multi_reduction <add>, %0, %cst [1] : vector<16x128xf32> to vector<16xf32>
    %2 = vector.shape_cast %1 : vector<16xf32> to vector<16x1xf32>
    %cst_1 = arith.constant 1.280000e+02 : f32
    %3 = vector.broadcast %cst_1 : f32 to vector<16x1xf32>
    %4 = arith.divf %2, %3 : vector<16x1xf32>
    %5 = vector.broadcast %4 : vector<16x1xf32> to vector<16x128xf32>
    %6 = arith.subf %0, %5 : vector<16x128xf32>
    %7 = arith.mulf %6, %6 : vector<16x128xf32>
    %cst_2 = arith.constant dense<0.000000e+00> : vector<16xf32>
    %8 = vector.multi_reduction <add>, %7, %cst_2 [1] : vector<16x128xf32> to vector<16xf32>
    %9 = vector.shape_cast %8 : vector<16xf32> to vector<16x1xf32>
    %cst_3 = arith.constant 1.270000e+02 : f32
    %10 = vector.broadcast %cst_3 : f32 to vector<16x1xf32>
    %11 = arith.divf %9, %10 : vector<16x1xf32>
    %12 = math.sqrt %11 : vector<16x1xf32>
    %c0_4 = arith.constant 0 : index
    %c0_5 = arith.constant 0 : index
    %13 = vector.load %arg3[%c0_4, %c0_5] : memref<1x128xf32, #tpu.memory_space<vmem>>, vector<1x128xf32>
    %cst_6 = arith.constant 9.99999997E-7 : f32
    %14 = vector.broadcast %cst_6 : f32 to vector<16x1xf32>
    %15 = arith.addf %12, %14 : vector<16x1xf32>
    %16 = vector.broadcast %15 : vector<16x1xf32> to vector<16x128xf32>
    %17 = arith.divf %6, %16 : vector<16x128xf32>
    %18 = vector.broadcast %13 : vector<1x128xf32> to vector<16x128xf32>
    %19 = arith.mulf %18, %17 : vector<16x128xf32>
    %c0_7 = arith.constant 0 : index
    %c0_8 = arith.constant 0 : index
    %20 = vector.load %arg4[%c0_7, %c0_8] : memref<1x128xf32, #tpu.memory_space<vmem>>, vector<1x128xf32>
    %21 = vector.broadcast %20 : vector<1x128xf32> to vector<16x128xf32>
    %22 = arith.addf %19, %21 : vector<16x128xf32>
    %23 = arith.truncf %22 : vector<16x128xf32> to vector<16x128xbf16>
    %c0_9 = arith.constant 0 : index
    %c0_10 = arith.constant 0 : index
    %24 = vector.load %arg5[%c0_9, %c0_10] : memref<128x2048xbf16, #tpu.memory_space<vmem>>, vector<128x2048xbf16>
    %cst_11 = arith.constant dense<0.000000e+00> : vector<16x2048xf32>
    %25 = tpu.matmul %23, %24, %cst_11 {dimension_numbers = #tpu.dot_dimension_numbers<[1], [0], [0], [1], [0, 0, 1, 1], [], []>} : vector<16x128xbf16>, vector<128x2048xbf16>, vector<16x2048xf32> -> vector<16x2048xf32>
    %c0_12 = arith.constant 0 : index
    %c0_13 = arith.constant 0 : index
    %26 = vector.load %arg6[%c0_12, %c0_13] : memref<1x2048xf32, #tpu.memory_space<vmem>>, vector<1x2048xf32>
    %27 = vector.broadcast %26 : vector<1x2048xf32> to vector<16x2048xf32>
    %28 = arith.addf %25, %27 : vector<16x2048xf32>
    %cst_14 = arith.constant 0.000000e+00 : f32
    %29 = vector.broadcast %cst_14 : f32 to vector<16x2048xf32>
    %30 = arith.maximumf %28, %29 : vector<16x2048xf32>
    %31 = arith.truncf %30 : vector<16x2048xf32> to vector<16x2048xbf16>
    %c0_15 = arith.constant 0 : index
    %c0_16 = arith.constant 0 : index
    %32 = vector.load %arg7[%c0_15, %c0_16] : memref<2048x128xbf16, #tpu.memory_space<vmem>>, vector<2048x128xbf16>
    %cst_17 = arith.constant dense<0.000000e+00> : vector<16x128xf32>
    %33 = tpu.matmul %31, %32, %cst_17 {dimension_numbers = #tpu.dot_dimension_numbers<[1], [0], [0], [1], [0, 0, 1, 1], [], []>} : vector<16x2048xbf16>, vector<2048x128xbf16>, vector<16x128xf32> -> vector<16x128xf32>
    %c0_18 = arith.constant 0 : index
    %c0_19 = arith.constant 0 : index
    %34 = vector.load %arg8[%c0_18, %c0_19] : memref<1x128xf32, #tpu.memory_space<vmem>>, vector<1x128xf32>
    %35 = vector.broadcast %34 : vector<1x128xf32> to vector<16x128xf32>
    %36 = arith.addf %33, %35 : vector<16x128xf32>
    %37 = arith.addf %0, %36 : vector<16x128xf32>
    %c0_20 = arith.constant 0 : index
    %c0_21 = arith.constant 0 : index
    %38 = vector.load %arg9[%c0_20, %c0_21] : memref<16x128xf32, #tpu.memory_space<vmem>>, vector<16x128xf32>
    tpu.vector_store %arg9[%c0_20, %c0_21], %37 {strides = array<i32>} : memref<16x128xf32, #tpu.memory_space<vmem>>, vector<16x128xf32>,
    return
  }
  func.func @transform_0(%arg0: i32, %arg1: memref<1xi32, #tpu.memory_space<smem>>) -> (i32, i32) {
    %c0_i32 = arith.constant 0 : i32
    %c0_i32_0 = arith.constant 0 : i32
    return %arg0, %c0_i32 : i32, i32
  }
  func.func @transform_1(%arg0: i32, %arg1: memref<1xi32, #tpu.memory_space<smem>>) -> (i32, i32) {
    %c0_i32 = arith.constant 0 : i32
    %c0_i32_0 = arith.constant 0 : i32
    %c0_i32_1 = arith.constant 0 : i32
    return %c0_i32, %c0_i32_0 : i32, i32
  }
  func.func @transform_2(%arg0: i32, %arg1: memref<1xi32, #tpu.memory_space<smem>>) -> (i32, i32) {
    %c0_i32 = arith.constant 0 : i32
    %c0_i32_0 = arith.constant 0 : i32
    %c0_i32_1 = arith.constant 0 : i32
    return %c0_i32, %c0_i32_0 : i32, i32
  }
  func.func @transform_3(%arg0: i32, %arg1: memref<1xi32, #tpu.memory_space<smem>>) -> (i32, i32) {
    %c0_i32 = arith.constant 0 : i32
    %c0_i32_0 = arith.constant 0 : i32
    %c0_i32_1 = arith.constant 0 : i32
    return %c0_i32, %c0_i32_0 : i32, i32
  }
  func.func @transform_4(%arg0: i32, %arg1: memref<1xi32, #tpu.memory_space<smem>>) -> (i32, i32) {
    %c0_i32 = arith.constant 0 : i32
    %c0_i32_0 = arith.constant 0 : i32
    %c0_i32_1 = arith.constant 0 : i32
    return %c0_i32, %c0_i32_0 : i32, i32
  }
  func.func @transform_5(%arg0: i32, %arg1: memref<1xi32, #tpu.memory_space<smem>>) -> (i32, i32) {
    %c0_i32 = arith.constant 0 : i32
    %c0_i32_0 = arith.constant 0 : i32
    %c0_i32_1 = arith.constant 0 : i32
    return %c0_i32, %c0_i32_0 : i32, i32
  }
  func.func @transform_6(%arg0: i32, %arg1: memref<1xi32, #tpu.memory_space<smem>>) -> (i32, i32) {
    %c0_i32 = arith.constant 0 : i32
    %c0_i32_0 = arith.constant 0 : i32
    %c0_i32_1 = arith.constant 0 : i32
    return %c0_i32, %c0_i32_0 : i32, i32
  }
  func.func @transform_7(%arg0: i32, %arg1: memref<1xi32, #tpu.memory_space<smem>>) -> (i32, i32) {
    %c0_i32 = arith.constant 0 : i32
    %c0_i32_0 = arith.constant 0 : i32
    return %arg0, %c0_i32 : i32, i32
  }
}

</mosaic_0001>

<bundles_post_ra>
// kernel: tpu_custom_call.1
= control target key start
LH: loop header
LB: loop body
LE: loop exit
PB: predicated region body
PF: predicated region fallthrough
CT: control target
= control target key end

     0   :  { %14 = vsyncpa [#allocation5], 0  ;;  %s3661_s0 = inlined_call_operand.<no memory space> [shape: s32[1], index: 0, kind: input, shape index: {}]   ;;  %s3662_s1 = inlined_call_operand.hbm [shape: f32[16,128], index: 1, kind: input, shape index: {}]   ;;  %s3663_s2 = inlined_call_operand.vmem [shape: f32[1,128], index: 2, kind: input, shape index: {}]   ;;  %s3664_s3 = inlined_call_operand.vmem [shape: f32[1,128], index: 3, kind: input, shape index: {}]   ;;  %s3665_s4 = inlined_call_operand.hbm [shape: bf16[128,2048], index: 4, kind: input, shape index: {}]   ;;  %s3666_s5 = inlined_call_operand.vmem [shape: f32[1,2048], index: 5, kind: input, shape index: {}]   ;;  %s3667_s6 = inlined_call_operand.hbm [shape: bf16[2048,128], index: 6, kind: input, shape index: {}]   ;;  %s3668_s7 = inlined_call_operand.vmem [shape: f32[1,128], index: 7, kind: input, shape index: {}]   ;;  %s3669_s8 = inlined_call_operand.hbm [shape: f32[16,128], index: 8, kind: output, shape index: {}]  }
   0x1   :  { %15 = vsyncpa [#allocation8], 0 }
   0x2   :  { %16 = vsyncpa [#allocation6], 0  ;;  %s3432_s26 = smov [#allocation7]   ;;  %s3338_s30 = scalar_lea.hbm %s3665_s4, 16384 }
   0x3   :  { %s38_s27 = sshll.u32 %s3432_s26, 4  ;;  %p3339_p0 = scmp.ne.s32.totalorder %s3665_s4, %s3338_s30  ;;  %s39_s27 = int_to_ptr.vmem [resolvable:$true] %s38_s27 }
   0x4   :  { %p3342_p1 = scmp.lt.u32.totalorder %s3338_s30, %s3665_s4 }
   0x6   :  { %p3344_p2 = pnand %p3342_p1, %p3339_p0 }
   0x8   :  { %3347 = shalt.err (!%p3344_p2)
}
   0x9   :  { %s3348_s13 = scalar_lea.vmem %s39_s27, 16384  ;;  %p3353_p4 = scmp.lt.s32.totalorder %s39_s27, %s39_s27 }
   0xa   :  { %p3349_p3 = scmp.ne.s32.totalorder %s39_s27, %s3348_s13  ;;  %p3354_p5 = scmp.lt.s32.totalorder %s3348_s13, %s3348_s13 }
   0xc   :  { %p3355_p6 = por %p3354_p5, %p3353_p4 }
   0xe   :  { %p3356_p7 = pnand %p3355_p6, %p3349_p3 }
  0x10   :  { %3359 = shalt.err (!%p3356_p7)
}
  0x11   :  { %s3433_s14 = smov 1024   ;;  %s3434_s15 = smov 64  }
  0x12   :  { %44 = dma.hbm_to_vmem [thread:$0]  %s3665_s4, 16384, %s39_s27, [#allocation8], %s3433_s14, %s3433_s14, %s3434_s15  }
  0x13   :  { %s3435_s18 = smov [#allocation4]   ;;  %s3360_s22 = scalar_lea.hbm %s3662_s1, 256 }
  0x14   :  { %s22_s19 = sshll.u32 %s3435_s18, 4  ;;  %p3361_p8 = scmp.ne.s32.totalorder %s3662_s1, %s3360_s22  ;;  %s23_s19 = int_to_ptr.vmem [resolvable:$true] %s22_s19 }
  0x15   :  { %p3364_p9 = scmp.lt.u32.totalorder %s3360_s22, %s3662_s1 }
  0x17   :  { %p3366_p10 = pnand %p3364_p9, %p3361_p8 }
  0x19   :  { %3369 = shalt.err (!%p3366_p10)
}
  0x1a   :  { %s3370_s26 = scalar_lea.vmem %s23_s19, 256  ;;  %p3375_p12 = scmp.lt.s32.totalorder %s23_s19, %s23_s19 }
  0x1b   :  { %p3371_p11 = scmp.ne.s32.totalorder %s23_s19, %s3370_s26  ;;  %p3376_p13 = scmp.lt.s32.totalorder %s3370_s26, %s3370_s26 }
  0x1d   :  { %p3377_p0 = por %p3376_p13, %p3375_p12 }
  0x1f   :  { %p3378_p1 = pnand %p3377_p0, %p3371_p11 }
  0x21   :  { %3381 = shalt.err (!%p3378_p1)
}
  0x22   :  { %s3436_s4 = smov 128   ;;  %s3437_s27 = smov 8  }
  0x23   :  { %28 = dma.hbm_to_vmem [thread:$0]  %s3662_s1, 256, %s23_s19, [#allocation5], %s3436_s4, %s3436_s4, %s3437_s27  }
  0x24   :  { %s3438_s30 = smov [#allocation9]   ;;  %s3382_s12 = scalar_lea.hbm %s3667_s6, 16384 }
  0x25   :  { %s52_s9 = sshll.u32 %s3438_s30, 4  ;;  %p3383_p2 = scmp.ne.s32.totalorder %s3667_s6, %s3382_s12  ;;  %s53_s9 = int_to_ptr.vmem [resolvable:$true] %s52_s9 }
  0x26   :  { %p3386_p3 = scmp.lt.u32.totalorder %s3382_s12, %s3667_s6 }
  0x28   :  { %p3388_p4 = pnand %p3386_p3, %p3383_p2 }
  0x2a   :  { %3391 = shalt.err (!%p3388_p4)
}
  0x2b   :  { %s3392_s18 = scalar_lea.vmem %s53_s9, 16384  ;;  %p3397_p6 = scmp.lt.s32.totalorder %s53_s9, %s53_s9 }
  0x2c   :  { %p3393_p5 = scmp.ne.s32.totalorder %s53_s9, %s3392_s18  ;;  %p3398_p7 = scmp.lt.s32.totalorder %s3392_s18, %s3392_s18 }
  0x2e   :  { %p3399_p8 = por %p3398_p7, %p3397_p6 }
  0x30   :  { %p3400_p9 = pnand %p3399_p8, %p3393_p5 }
  0x32   :  { %3403 = shalt.err (!%p3400_p9)
}
  0x33   :  { %s3439_s1 = smov 4  }
  0x34   :  { %58 = dma.hbm_to_vmem [thread:$0]  %s3667_s6, 16384, %s53_s9, [#allocation8], %s3434_s15, %s3434_s15, %s3439_s1  }
  0x35   :  { %3426 = dma.done.wait [#allocation5], 256  }
  0x36   :  { %3427 = vsyncadd [#allocation5], 4294967040 }
  0x37   :  { %3428 = dma.done.wait [#allocation8], 32768  }
  0x38   :  { %3429 = vsyncadd [#allocation8], 4294934528  ;;  %v71_v0 = vld [vmem:[#allocation4] sm:$0xff]  ;;  %v72_v1 = vld [vmem:[#allocation4 + $0x8] sm:$0xff] }
  0x39   :  { %73 = vadd.xlane.f32.xlu0 %v71_v0  ;;  %v130_v10 = vld [vmem:[#allocation7] sm:$0xff]  ;;  %v131_v12 = vld [vmem:[#allocation7 + $0x8] sm:$0xff] }
  0x3a   :  { %v138_v11 = vld [vmem:[#allocation7 + $0x40] sm:$0xff]  ;;  %v139_v14 = vld [vmem:[#allocation7 + $0x48] sm:$0xff] }
  0x3b   :  { %v2758_v13 = vcombine.high %v130_v10, %v138_v11  ;;  %v2760_v15 = vcombine.high %v131_v12, %v139_v14  ;;  %v2757_v16 = vcombine.low %v130_v10, %v138_v11  ;;  %v2759_v17 = vcombine.low %v131_v12, %v139_v14  ;;  %v146_v18 = vld [vmem:[#allocation7 + $0x80] sm:$0xff]  ;;  %v147_v20 = vld [vmem:[#allocation7 + $0x88] sm:$0xff]  ;;  %v3537_v12 = vld [vmem:[#allocation7 + $0x10] sm:$0xff] }
  0x3c   :  { %v154_v19 = vld [vmem:[#allocation7 + $0xc0] sm:$0xff]  ;;  %v155_v22 = vld [vmem:[#allocation7 + $0xc8] sm:$0xff]  ;;  %v3541_v14 = vld [vmem:[#allocation7 + $0x18] sm:$0xff] }
  0x3d   :  { %75 = vadd.xlane.f32.xlu0 %v72_v1  ;;  %982 = vmatprep.subr.bf16.mxu0 %v2758_v13  ;;  %v2774_v21 = vcombine.high %v146_v18, %v154_v19  ;;  %v2776_v23 = vcombine.high %v147_v20, %v155_v22  ;;  %v2773_v24 = vcombine.low %v146_v18, %v154_v19  ;;  %v162_v26 = vld [vmem:[#allocation7 + $0x100] sm:$0xff]  ;;  %v163_v28 = vld [vmem:[#allocation7 + $0x108] sm:$0xff]  ;;  %v3539_v13 = vld [vmem:[#allocation7 + $0x50] sm:$0xff] }
  0x3e   :  { %1025 = vmatprep.subr.bf16.mxu1 %v2760_v15  ;;  %983 = vmatpush1.bf16.msra.mxu0 %v2757_v16  ;;  %v2775_v25 = vcombine.low %v147_v20, %v155_v22  ;;  %v170_v27 = vld [vmem:[#allocation7 + $0x140] sm:$0xff]  ;;  %v171_v30 = vld [vmem:[#allocation7 + $0x148] sm:$0xff]  ;;  %v3440_v15 = vmov 0   ;;  %v2761_v16 = vcombine.low %v3537_v12, %v3539_v13  ;;  %v141_v18 = vld [vmem:[#allocation7 + $0x58] sm:$0xff] }
  0x3f   :  { %1026 = vmatpush1.bf16.msra.mxu1 %v2759_v17  ;;  %984 = vmatprep.subr.bf16.mxu0 %v2774_v21  ;;  %v2790_v29 = vcombine.high %v162_v26, %v170_v27  ;;  %v2792_v31 = vcombine.high %v163_v28, %v171_v30  ;;  %v2789_v32 = vcombine.low %v162_v26, %v170_v27  ;;  %v178_v34 = vld [vmem:[#allocation7 + $0x180] sm:$0xff]  ;;  %v179_v36 = vld [vmem:[#allocation7 + $0x188] sm:$0xff] }
  0x40   :  { %1027 = vmatprep.subr.bf16.mxu1 %v2776_v23  ;;  %v2791_v33 = vcombine.low %v163_v28, %v171_v30  ;;  %v186_v35 = vld [vmem:[#allocation7 + $0x1c0] sm:$0xff]  ;;  %v187_v38 = vld [vmem:[#allocation7 + $0x1c8] sm:$0xff]  ;;  %1014 = vmatprep.mubr.bf16.mxu0 %v3440_v15  ;;  %v2762_v17 = vcombine.high %v3537_v12, %v3539_v13  ;;  %v2763_v19 = vcombine.low %v3541_v14, %v141_v18 }
  0x41   :  { %v2806_v37 = vcombine.high %v178_v34, %v186_v35  ;;  %v2808_v39 = vcombine.high %v179_v36, %v187_v38  ;;  %v2805_v40 = vcombine.low %v178_v34, %v186_v35  ;;  %v2807_v41 = vcombine.low %v179_v36, %v187_v38  ;;  %v194_v42 = vld [vmem:[#allocation7 + $0x200] sm:$0xff]  ;;  %v195_v44 = vld [vmem:[#allocation7 + $0x208] sm:$0xff]  ;;  %1057 = vmatprep.mubr.bf16.mxu1 %v3440_v15 }
  0x42   :  { %985 = vmatpush1.bf16.msra.mxu0 %v2773_v24  ;;  %v202_v43 = vld [vmem:[#allocation7 + $0x240] sm:$0xff]  ;;  %v203_v46 = vld [vmem:[#allocation7 + $0x248] sm:$0xff]  ;;  %v2764_v20 = vcombine.high %v3541_v14, %v141_v18  ;;  %v212_v14 = vld [vmem:[#allocation7 + $0x290] sm:$0xff] }
  0x43   :  { %1028 = vmatpush1.bf16.msra.mxu1 %v2775_v25  ;;  %986 = vmatprep.subr.bf16.mxu0 %v2790_v29  ;;  %v2822_v45 = vcombine.high %v194_v42, %v202_v43  ;;  %v2824_v47 = vcombine.high %v195_v44, %v203_v46  ;;  %v2821_v48 = vcombine.low %v194_v42, %v202_v43  ;;  %v210_v50 = vld [vmem:[#allocation7 + $0x280] sm:$0xff]  ;;  %v211_v52 = vld [vmem:[#allocation7 + $0x288] sm:$0xff]  ;;  %v2756_v43 = vld [vmem:[%s3664_s3] ss:$0 sm:$0xff] }
  0x44   :  { %1029 = vmatprep.subr.bf16.mxu1 %v2792_v31  ;;  %v2823_v49 = vcombine.low %v195_v44, %v203_v46  ;;  %v218_v51 = vld [vmem:[#allocation7 + $0x2c0] sm:$0xff]  ;;  %v219_v54 = vld [vmem:[#allocation7 + $0x2c8] sm:$0xff]  ;;  %v156_v46 = vld [vmem:[#allocation7 + $0xd0] sm:$0xff] }
  0x45   :  { %v2838_v53 = vcombine.high %v210_v50, %v218_v51  ;;  %v2840_v55 = vcombine.high %v211_v52, %v219_v54  ;;  %v2837_v56 = vcombine.low %v210_v50, %v218_v51  ;;  %v2839_v57 = vcombine.low %v211_v52, %v219_v54  ;;  %v226_v58 = vld [vmem:[#allocation7 + $0x300] sm:$0xff]  ;;  %v227_v60 = vld [vmem:[#allocation7 + $0x308] sm:$0xff]  ;;  %v172_v54 = vld [vmem:[#allocation7 + $0x150] sm:$0xff] }
  0x46   :  { %987 = vmatpush1.bf16.msra.mxu0 %v2789_v32  ;;  %v234_v59 = vld [vmem:[#allocation7 + $0x340] sm:$0xff]  ;;  %v235_v62 = vld [vmem:[#allocation7 + $0x348] sm:$0xff]  ;;  %v221_v18 = vld [vmem:[#allocation7 + $0x2d8] sm:$0xff] }
  0x47   :  { %1030 = vmatpush1.bf16.msra.mxu1 %v2791_v33  ;;  %988 = vmatprep.subr.bf16.mxu0 %v2806_v37  ;;  %v2854_v61 = vcombine.high %v226_v58, %v234_v59  ;;  %v2856_v63 = vcombine.high %v227_v60, %v235_v62 }
  0x48   :  { %1031 = vmatprep.subr.bf16.mxu1 %v2808_v39  ;;  %v2755_v39 = vld [vmem:[%s3663_s2] ss:$0 sm:$0xff] }
  0x4a   :  { %989 = vmatpush1.bf16.msra.mxu0 %v2805_v40 }
  0x4b   :  { %1032 = vmatpush1.bf16.msra.mxu1 %v2807_v41  ;;  %990 = vmatprep.subr.bf16.mxu0 %v2822_v45  ;;  %v148_v45 = vld [vmem:[#allocation7 + $0x90] sm:$0xff] }
  0x4c   :  { %1033 = vmatprep.subr.bf16.mxu1 %v2824_v47  ;;  %v149_v47 = vld [vmem:[#allocation7 + $0x98] sm:$0xff]  ;;  %v2778_v51 = vcombine.high %v148_v45, %v156_v46 }
  0x4e   :  { %991 = vmatpush1.bf16.msra.mxu0 %v2821_v48  ;;  %v157_v48 = vld [vmem:[#allocation7 + $0xd8] sm:$0xff] }
  0x4f   :  { %1034 = vmatpush1.bf16.msra.mxu1 %v2823_v49  ;;  %992 = vmatprep.subr.bf16.mxu0 %v2838_v53  ;;  %v2780_v52 = vcombine.high %v149_v47, %v157_v48  ;;  %v164_v53 = vld [vmem:[#allocation7 + $0x110] sm:$0xff] }
  0x50   :  { %1035 = vmatprep.subr.bf16.mxu1 %v2840_v55  ;;  %v165_v55 = vld [vmem:[#allocation7 + $0x118] sm:$0xff] }
  0x52   :  { %993 = vmatpush1.bf16.msra.mxu0 %v2837_v56  ;;  %v173_v56 = vld [vmem:[#allocation7 + $0x158] sm:$0xff] }
  0x53   :  { %1036 = vmatpush1.bf16.msra.mxu1 %v2839_v57  ;;  %994 = vmatprep.subr.bf16.mxu0 %v2854_v61  ;;  %v2779_v57 = vcombine.low %v149_v47, %v157_v48  ;;  %v188_v61 = vld [vmem:[#allocation7 + $0x1d0] sm:$0xff]  ;;  %v150_v47 = vld [vmem:[#allocation7 + $0xa0] sm:$0xff] }
  0x54   :  { %1037 = vmatprep.subr.bf16.mxu1 %v2856_v63  ;;  %v189_v63 = vld [vmem:[#allocation7 + $0x1d8] sm:$0xff]  ;;  %v158_v48 = vld [vmem:[#allocation7 + $0xe0] sm:$0xff] }
  0xc6   :  { %v74_v2 = vpop.xlane.xlu0 %73 }
  0xc7   :  { %v78_v3 = vmul.f32 0.0078125, %v74_v2  ;;  %v242_v2 = vld [vmem:[#allocation7 + $0x380] sm:$0xff] }
  0xc9   :  { %v3529_v4 = vsub.f32 %v71_v0, %v78_v3  ;;  %v2853_v0 = vcombine.low %v226_v58, %v234_v59  ;;  %v250_v3 = vld [vmem:[#allocation7 + $0x3c0] sm:$0xff]  ;;  %v2794_v58 = vcombine.high %v164_v53, %v172_v54  ;;  %v2796_v59 = vcombine.high %v165_v55, %v173_v56 }
  0xca   :  { %v76_v5 = vpop.xlane.xlu0 %75  ;;  %v2869_v10 = vcombine.low %v242_v2, %v250_v3 }
  0xcb   :  { %v79_v6 = vmul.f32 0.0078125, %v76_v5  ;;  %v82_v7 = vmul.f32 %v3529_v4, %v3529_v4  ;;  %995 = vmatpush1.bf16.msra.mxu0 %v2853_v0  ;;  %v243_v5 = vld [vmem:[#allocation7 + $0x388] sm:$0xff]  ;;  %v2793_v0 = vcombine.low %v164_v53, %v172_v54  ;;  %v2782_v53 = vcombine.high %v150_v47, %v158_v48 }
  0xcd   :  { %v3533_v8 = vsub.f32 %v72_v1, %v79_v6  ;;  %84 = vadd.xlane.f32.xlu1 %v82_v7  ;;  %v2855_v1 = vcombine.low %v227_v60, %v235_v62  ;;  %v2870_v6 = vcombine.high %v242_v2, %v250_v3  ;;  %v251_v7 = vld [vmem:[#allocation7 + $0x3c8] sm:$0xff]  ;;  %v180_v60 = vld [vmem:[#allocation7 + $0x190] sm:$0xff]  ;;  %v181_v62 = vld [vmem:[#allocation7 + $0x198] sm:$0xff] }
  0xce   :  { %v2871_v11 = vcombine.low %v243_v5, %v251_v7  ;;  %v2810_v2 = vcombine.high %v180_v60, %v188_v61  ;;  %v2812_v3 = vcombine.high %v181_v62, %v189_v63 }
  0xcf   :  { %v83_v9 = vmul.f32 %v3533_v8, %v3533_v8  ;;  %1038 = vmatpush1.bf16.msra.mxu1 %v2855_v1  ;;  %996 = vmatprep.subr.bf16.mxu0 %v2870_v6  ;;  %v2795_v1 = vcombine.low %v165_v55, %v173_v56  ;;  %v204_v6 = vld [vmem:[#allocation7 + $0x250] sm:$0xff]  ;;  %v166_v55 = vld [vmem:[#allocation7 + $0x120] sm:$0xff] }
  0xd0   :  { %997 = vmatpush1.bf16.msra.mxu0 %v2869_v10  ;;  %v2809_v10 = vcombine.low %v180_v60, %v188_v61  ;;  %v174_v56 = vld [vmem:[#allocation7 + $0x160] sm:$0xff] }
  0xd1   :  { %86 = vadd.xlane.f32.xlu1 %v83_v9  ;;  %v2872_v9 = vcombine.high %v243_v5, %v251_v7  ;;  %1068 = vmatprep.subr.bf16.mxu0 %v2762_v17  ;;  %v196_v5 = vld [vmem:[#allocation7 + $0x210] sm:$0xff]  ;;  %v197_v7 = vld [vmem:[#allocation7 + $0x218] sm:$0xff]  ;;  %v2798_v60 = vcombine.high %v166_v55, %v174_v56 }
  0xd2   :  { %v2826_v12 = vcombine.high %v196_v5, %v204_v6  ;;  %v213_v17 = vld [vmem:[#allocation7 + $0x298] sm:$0xff] }
  0xd3   :  { %1039 = vmatprep.subr.bf16.mxu1 %v2872_v9  ;;  %v205_v9 = vld [vmem:[#allocation7 + $0x258] sm:$0xff] }
  0xd4   :  { %1040 = vmatpush1.bf16.msra.mxu1 %v2871_v11  ;;  %v2811_v11 = vcombine.low %v181_v62, %v189_v63  ;;  %v2828_v13 = vcombine.high %v197_v7, %v205_v9  ;;  %v182_v62 = vld [vmem:[#allocation7 + $0x1a0] sm:$0xff] }
  0xd5   :  { %1111 = vmatprep.subr.bf16.mxu1 %v2764_v20  ;;  %v2827_v20 = vcombine.low %v197_v7, %v205_v9  ;;  %v190_v63 = vld [vmem:[#allocation7 + $0x1e0] sm:$0xff] }
  0xd6   :  { %v198_v7 = vld [vmem:[#allocation7 + $0x220] sm:$0xff] }
  0xd7   :  { %v206_v9 = vld [vmem:[#allocation7 + $0x260] sm:$0xff] }
 0x15a   :  { %v85_v21 = vpop.xlane.xlu1 %84 }
 0x15b   :  { %v89_v22 = vmul.f32 0.007874016, %v85_v21 }
 0x15d   :  { %3328 = vrsqrt.f32 %v89_v22  ;;  %vm93_vm0 = vcmp.eq.f32.partialorder %v89_v22, inf  ;;  %v96_v27 = vand.u32 2147483648, %v89_v22  ;;  %vm95_vm1 = vcmp.eq.f32.partialorder %v89_v22, 0.0 }
 0x15e   :  { %v87_v23 = vpop.xlane.xlu1 %86 }
 0x15f   :  { %v90_v24 = vmul.f32 0.007874016, %v87_v23  ;;  %v228_v23 = vld [vmem:[#allocation7 + $0x310] sm:$0xff] }
 0x161   :  { %3330 = vrsqrt.f32 %v90_v24  ;;  %vm100_vm2 = vcmp.eq.f32.partialorder %v90_v24, inf  ;;  %v103_v33 = vand.u32 2147483648, %v90_v24  ;;  %vm102_vm3 = vcmp.eq.f32.partialorder %v90_v24, 0.0 }
 0x167   :  { %v3329_v25 = vpop.eup %3328 }
 0x168   :  { %v92_v26 = vmul.f32 %v3329_v25, %v89_v22  ;;  %v229_v25 = vld [vmem:[#allocation7 + $0x318] sm:$0xff] }
 0x16a   :  { %v94_v28 = vsel %vm93_vm0, %v89_v22, %v92_v26  ;;  %v2844_v22 = vcombine.high %v213_v17, %v221_v18  ;;  %v237_v26 = vld [vmem:[#allocation7 + $0x358] sm:$0xff] }
 0x16b   :  { %v3331_v29 = vpop.eup %3330  ;;  %v97_v30 = vsel %vm95_vm1, %v96_v27, %v94_v28  ;;  %v2843_v28 = vcombine.low %v213_v17, %v221_v18  ;;  %v214_v17 = vld [vmem:[#allocation7 + $0x2a0] sm:$0xff] }
 0x16c   :  { %v106_v31 = vadd.f32 1e-06, %v97_v30  ;;  %v99_v32 = vmul.f32 %v3331_v29, %v90_v24  ;;  %v2860_v30 = vcombine.high %v229_v25, %v237_v26  ;;  %v222_v18 = vld [vmem:[#allocation7 + $0x2e0] sm:$0xff] }
 0x16e   :  { %3332 = vrcp.f32 %v106_v31  ;;  %v101_v34 = vsel %vm100_vm2, %v90_v24, %v99_v32  ;;  %v236_v24 = vld [vmem:[#allocation7 + $0x350] sm:$0xff] }
 0x16f   :  { %v104_v35 = vsel %vm102_vm3, %v103_v33, %v101_v34  ;;  %v2858_v29 = vcombine.high %v228_v23, %v236_v24  ;;  %v244_v31 = vld [vmem:[#allocation7 + $0x390] sm:$0xff]  ;;  %v245_v33 = vld [vmem:[#allocation7 + $0x398] sm:$0xff] }
 0x170   :  { %v107_v36 = vadd.f32 1e-06, %v104_v35  ;;  %v252_v32 = vld [vmem:[#allocation7 + $0x3d0] sm:$0xff]  ;;  %v253_v34 = vld [vmem:[#allocation7 + $0x3d8] sm:$0xff]  ;;  %v2857_v35 = vcombine.low %v228_v23, %v236_v24  ;;  %v2846_v23 = vcombine.high %v214_v17, %v222_v18 }
 0x172   :  { %3334 = vrcp.f32 %v107_v36  ;;  %v2859_v36 = vcombine.low %v229_v25, %v237_v26  ;;  %v230_v25 = vld [vmem:[#allocation7 + $0x320] sm:$0xff] }
 0x173   :  { %v238_v26 = vld [vmem:[#allocation7 + $0x360] sm:$0xff] }
 0x178   :  { %v3333_v37 = vpop.eup %3332 }
 0x179   :  { %v109_v38 = vmul.f32 %v3333_v37, %v3529_v4  ;;  %v2874_v37 = vcombine.high %v244_v31, %v252_v32 }
 0x17b   :  { %v118_v41 = vmul.f32 %v2755_v39, %v109_v38  ;;  %v2876_v38 = vcombine.high %v245_v33, %v253_v34 }
 0x17c   :  { %v3335_v40 = vpop.eup %3334 }
 0x17d   :  { %v111_v42 = vmul.f32 %v3335_v40, %v3533_v8  ;;  %v127_v49 = vadd.f32 %v2756_v43, %v118_v41  ;;  %v2777_v8 = vcombine.low %v148_v45, %v156_v46  ;;  %v142_v40 = vld [vmem:[#allocation7 + $0x60] sm:$0xff]  ;;  %v135_v41 = vld [vmem:[#allocation7 + $0x28] sm:$0xff] }
 0x17f   :  { %v119_v44 = vmul.f32 %v2755_v39, %v111_v42  ;;  %v134_v39 = vld [vmem:[#allocation7 + $0x20] sm:$0xff]  ;;  %v143_v42 = vld [vmem:[#allocation7 + $0x68] sm:$0xff] }
 0x180   :  { %v2766_v45 = vcombine.high %v134_v39, %v142_v40  ;;  %v2768_v46 = vcombine.high %v135_v41, %v143_v42 }
 0x181   :  { %v128_v50 = vadd.f32 %v2756_v43, %v119_v44  ;;  %v2873_v43 = vcombine.low %v244_v31, %v252_v32  ;;  %v2875_v44 = vcombine.low %v245_v33, %v253_v34  ;;  %v2862_v31 = vcombine.high %v230_v25, %v238_v26  ;;  %v246_v33 = vld [vmem:[#allocation7 + $0x3a0] sm:$0xff] }
 0x182   :  { %v254_v34 = vld [vmem:[#allocation7 + $0x3e0] sm:$0xff] }
 0x183   :  { %v3559_v4 = vpack.c.bf16 %v128_v50, %v127_v49  ;;  %v151_v49 = vld [vmem:[#allocation7 + $0xa8] sm:$0xff] }
 0x184   :  { %v159_v50 = vld [vmem:[#allocation7 + $0xe8] sm:$0xff] }
 0x185   :  { %1015 = vmatmul.mubr.bf16.vlgmr.msra.gmra.mrb[0].mxu0 %v3559_v4  ;;  %1058 = vmatmul.mubr.bf16.vlgmr.msra.gmra.mrb[0].mxu1 %v3559_v4  ;;  %v2784_v54 = vcombine.high %v151_v49, %v159_v50 }
 0x186   :  { %1069 = vmatpush1.bf16.msra.mxu0 %v2761_v16  ;;  %1112 = vmatpush1.bf16.msra.mxu1 %v2763_v19  ;;  %v220_v16 = vld [vmem:[#allocation7 + $0x2d0] sm:$0xff]  ;;  %v2825_v19 = vcombine.low %v196_v5, %v204_v6  ;;  %v2814_v5 = vcombine.high %v182_v62, %v190_v63 }
 0x187   :  { %1070 = vmatprep.subr.bf16.mxu0 %v2778_v51  ;;  %1113 = vmatprep.subr.bf16.mxu1 %v2780_v52  ;;  %v2842_v21 = vcombine.high %v212_v14, %v220_v16  ;;  %v2841_v27 = vcombine.low %v212_v14, %v220_v16  ;;  %v2765_v51 = vcombine.low %v134_v39, %v142_v40 }
 0x188   :  { %1100 = vmatprep.mubr.bf16.mxu0 %v3440_v15  ;;  %1143 = vmatprep.mubr.bf16.mxu1 %v3440_v15  ;;  %v2767_v52 = vcombine.low %v135_v41, %v143_v42  ;;  %v2830_v14 = vcombine.high %v198_v7, %v206_v9  ;;  %v2878_v39 = vcombine.high %v246_v33, %v254_v34  ;;  %v136_v41 = vld [vmem:[#allocation7 + $0x30] sm:$0xff] }
 0x189   :  { %v144_v42 = vld [vmem:[#allocation7 + $0x70] sm:$0xff] }
 0x18a   :  { %1071 = vmatpush1.bf16.msra.mxu0 %v2777_v8  ;;  %1114 = vmatpush1.bf16.msra.mxu1 %v2779_v57  ;;  %v167_v8 = vld [vmem:[#allocation7 + $0x128] sm:$0xff] }
 0x18b   :  { %1072 = vmatprep.subr.bf16.mxu0 %v2794_v58  ;;  %1115 = vmatprep.subr.bf16.mxu1 %v2796_v59  ;;  %v175_v57 = vld [vmem:[#allocation7 + $0x168] sm:$0xff]  ;;  %v2781_v58 = vcombine.low %v150_v47, %v158_v48  ;;  %v2783_v59 = vcombine.low %v151_v49, %v159_v50  ;;  %v2770_v47 = vcombine.high %v136_v41, %v144_v42  ;;  %v152_v49 = vld [vmem:[#allocation7 + $0xb0] sm:$0xff] }
 0x18c   :  { %v2800_v61 = vcombine.high %v167_v8, %v175_v57  ;;  %v160_v50 = vld [vmem:[#allocation7 + $0xf0] sm:$0xff] }
 0x18e   :  { %1073 = vmatpush1.bf16.msra.mxu0 %v2793_v0  ;;  %1116 = vmatpush1.bf16.msra.mxu1 %v2795_v1  ;;  %v183_v0 = vld [vmem:[#allocation7 + $0x1a8] sm:$0xff] }
 0x18f   :  { %1074 = vmatprep.subr.bf16.mxu0 %v2810_v2  ;;  %1117 = vmatprep.subr.bf16.mxu1 %v2812_v3  ;;  %v191_v1 = vld [vmem:[#allocation7 + $0x1e8] sm:$0xff]  ;;  %v2797_v2 = vcombine.low %v166_v55, %v174_v56  ;;  %v2799_v3 = vcombine.low %v167_v8, %v175_v57  ;;  %v2786_v55 = vcombine.high %v152_v49, %v160_v50  ;;  %v168_v8 = vld [vmem:[#allocation7 + $0x130] sm:$0xff] }
 0x190   :  { %v2816_v6 = vcombine.high %v183_v0, %v191_v1  ;;  %v176_v57 = vld [vmem:[#allocation7 + $0x170] sm:$0xff] }
 0x192   :  { %1075 = vmatpush1.bf16.msra.mxu0 %v2809_v10  ;;  %1118 = vmatpush1.bf16.msra.mxu1 %v2811_v11  ;;  %v199_v10 = vld [vmem:[#allocation7 + $0x228] sm:$0xff] }
 0x193   :  { %1076 = vmatprep.subr.bf16.mxu0 %v2826_v12  ;;  %1119 = vmatprep.subr.bf16.mxu1 %v2828_v13  ;;  %v207_v11 = vld [vmem:[#allocation7 + $0x268] sm:$0xff]  ;;  %v2813_v12 = vcombine.low %v182_v62, %v190_v63  ;;  %v2815_v13 = vcombine.low %v183_v0, %v191_v1  ;;  %v2802_v62 = vcombine.high %v168_v8, %v176_v57  ;;  %v184_v0 = vld [vmem:[#allocation7 + $0x1b0] sm:$0xff] }
 0x194   :  { %v2832_v16 = vcombine.high %v199_v10, %v207_v11  ;;  %v192_v1 = vld [vmem:[#allocation7 + $0x1f0] sm:$0xff] }
 0x196   :  { %1077 = vmatpush1.bf16.msra.mxu0 %v2825_v19  ;;  %1120 = vmatpush1.bf16.msra.mxu1 %v2827_v20  ;;  %v215_v19 = vld [vmem:[#allocation7 + $0x2a8] sm:$0xff] }
 0x197   :  { %1078 = vmatprep.subr.bf16.mxu0 %v2842_v21  ;;  %1121 = vmatprep.subr.bf16.mxu1 %v2844_v22  ;;  %v223_v20 = vld [vmem:[#allocation7 + $0x2e8] sm:$0xff]  ;;  %v2829_v21 = vcombine.low %v198_v7, %v206_v9  ;;  %v2831_v22 = vcombine.low %v199_v10, %v207_v11  ;;  %v2818_v7 = vcombine.high %v184_v0, %v192_v1  ;;  %v200_v10 = vld [vmem:[#allocation7 + $0x230] sm:$0xff] }
 0x198   :  { %v2848_v24 = vcombine.high %v215_v19, %v223_v20  ;;  %v208_v11 = vld [vmem:[#allocation7 + $0x270] sm:$0xff] }
 0x19a   :  { %1079 = vmatpush1.bf16.msra.mxu0 %v2841_v27  ;;  %1122 = vmatpush1.bf16.msra.mxu1 %v2843_v28  ;;  %v231_v27 = vld [vmem:[#allocation7 + $0x328] sm:$0xff] }
 0x19b   :  { %1080 = vmatprep.subr.bf16.mxu0 %v2858_v29  ;;  %1123 = vmatprep.subr.bf16.mxu1 %v2860_v30  ;;  %v239_v28 = vld [vmem:[#allocation7 + $0x368] sm:$0xff]  ;;  %v2845_v29 = vcombine.low %v214_v17, %v222_v18  ;;  %v2847_v30 = vcombine.low %v215_v19, %v223_v20  ;;  %v2834_v17 = vcombine.high %v200_v10, %v208_v11  ;;  %v216_v18 = vld [vmem:[#allocation7 + $0x2b0] sm:$0xff]  ;;  %v217_v20 = vld [vmem:[#allocation7 + $0x2b8] sm:$0xff] }
 0x19c   :  { %v2864_v32 = vcombine.high %v231_v27, %v239_v28  ;;  %v224_v19 = vld [vmem:[#allocation7 + $0x2f0] sm:$0xff] }
 0x19e   :  { %1081 = vmatpush1.bf16.msra.mxu0 %v2857_v35  ;;  %1124 = vmatpush1.bf16.msra.mxu1 %v2859_v36  ;;  %v247_v35 = vld [vmem:[#allocation7 + $0x3a8] sm:$0xff] }
 0x19f   :  { %1082 = vmatprep.subr.bf16.mxu0 %v2874_v37  ;;  %1125 = vmatprep.subr.bf16.mxu1 %v2876_v38  ;;  %v255_v36 = vld [vmem:[#allocation7 + $0x3e8] sm:$0xff]  ;;  %v2861_v37 = vcombine.low %v230_v25, %v238_v26  ;;  %v2863_v38 = vcombine.low %v231_v27, %v239_v28  ;;  %v232_v26 = vld [vmem:[#allocation7 + $0x330] sm:$0xff]  ;;  %v233_v28 = vld [vmem:[#allocation7 + $0x338] sm:$0xff] }
 0x1a0   :  { %v2880_v40 = vcombine.high %v247_v35, %v255_v36  ;;  %v240_v27 = vld [vmem:[#allocation7 + $0x370] sm:$0xff] }
 0x1a2   :  { %1083 = vmatpush1.bf16.msra.mxu0 %v2873_v43  ;;  %1126 = vmatpush1.bf16.msra.mxu1 %v2875_v44  ;;  %v137_v43 = vld [vmem:[#allocation7 + $0x38] sm:$0xff] }
 0x1a3   :  { %1154 = vmatprep.subr.bf16.mxu0 %v2766_v45  ;;  %1197 = vmatprep.subr.bf16.mxu1 %v2768_v46  ;;  %v145_v44 = vld [vmem:[#allocation7 + $0x78] sm:$0xff]  ;;  %v2877_v45 = vcombine.low %v246_v33, %v254_v34  ;;  %v2879_v46 = vcombine.low %v247_v35, %v255_v36  ;;  %v248_v34 = vld [vmem:[#allocation7 + $0x3b0] sm:$0xff] }
 0x1a4   :  { %v2772_v48 = vcombine.high %v137_v43, %v145_v44  ;;  %v256_v35 = vld [vmem:[#allocation7 + $0x3f0] sm:$0xff]  ;;  %v249_v36 = vld [vmem:[#allocation7 + $0x3b8] sm:$0xff] }
 0x1a5   :  { %1101 = vmatmul.mubr.bf16.vlgmr.msra.gmra.mrb[4].mxu0 %v3559_v4  ;;  %1144 = vmatmul.mubr.bf16.vlgmr.msra.gmra.mrb[4].mxu1 %v3559_v4 }
 0x1a6   :  { %1155 = vmatpush1.bf16.msra.mxu0 %v2765_v51  ;;  %1198 = vmatpush1.bf16.msra.mxu1 %v2767_v52  ;;  %v153_v51 = vld [vmem:[#allocation7 + $0xb8] sm:$0xff] }
 0x1a7   :  { %1156 = vmatprep.subr.bf16.mxu0 %v2782_v53  ;;  %1199 = vmatprep.subr.bf16.mxu1 %v2784_v54  ;;  %v161_v52 = vld [vmem:[#allocation7 + $0xf8] sm:$0xff]  ;;  %v2769_v53 = vcombine.low %v136_v41, %v144_v42  ;;  %v2771_v54 = vcombine.low %v137_v43, %v145_v44  ;;  %v2881_v42 = vcombine.low %v248_v34, %v256_v35  ;;  %v3200_v44 = vld [vmem:[#allocation9 + $0x40] sm:$0xff]  }
 0x1a8   :  { %1186 = vmatprep.mubr.bf16.mxu0 %v3440_v15  ;;  %1229 = vmatprep.mubr.bf16.mxu1 %v3440_v15  ;;  %v2788_v56 = vcombine.high %v153_v51, %v161_v52 }
 0x1aa   :  { %1157 = vmatpush1.bf16.msra.mxu0 %v2781_v58  ;;  %1200 = vmatpush1.bf16.msra.mxu1 %v2783_v59  ;;  %v169_v58 = vld [vmem:[#allocation7 + $0x138] sm:$0xff] }
 0x1ab   :  { %1158 = vmatprep.subr.bf16.mxu0 %v2798_v60  ;;  %1201 = vmatprep.subr.bf16.mxu1 %v2800_v61  ;;  %v177_v59 = vld [vmem:[#allocation7 + $0x178] sm:$0xff]  ;;  %v2785_v60 = vcombine.low %v152_v49, %v160_v50  ;;  %v2787_v61 = vcombine.low %v153_v51, %v161_v52  ;;  %v3205_v49 = vld [vmem:[#allocation9 + $0xc8] sm:$0xff]   ;;  %v3208_v52 = vld [vmem:[#allocation9 + $0x50] sm:$0xff]  }
 0x1ac   :  { %v2804_v63 = vcombine.high %v169_v58, %v177_v59  ;;  %v3206_v50 = vld [vmem:[#allocation9 + $0x8] sm:$0xff]  }
 0x1ad   :  { %v3207_v51 = vld [vmem:[#allocation9 + $0x88] sm:$0xff]  }
 0x1ae   :  { %1159 = vmatpush1.bf16.msra.mxu0 %v2797_v2  ;;  %1202 = vmatpush1.bf16.msra.mxu1 %v2799_v3  ;;  %v185_v2 = vld [vmem:[#allocation7 + $0x1b8] sm:$0xff] }
 0x1af   :  { %1160 = vmatprep.subr.bf16.mxu0 %v2814_v5  ;;  %1203 = vmatprep.subr.bf16.mxu1 %v2816_v6  ;;  %v193_v3 = vld [vmem:[#allocation7 + $0x1f8] sm:$0xff]  ;;  %v2801_v5 = vcombine.low %v168_v8, %v176_v57  ;;  %v2803_v6 = vcombine.low %v169_v58, %v177_v59  ;;  %v3216_v58 = vld [vmem:[#allocation9 + $0x60] sm:$0xff]  }
 0x1b0   :  { %v2820_v9 = vcombine.high %v185_v2, %v193_v3  ;;  %v3213_v8 = vld [vmem:[#allocation9 + $0xd8] sm:$0xff]   ;;  %v3217_v59 = vld [vmem:[#allocation9 + $0xe0] sm:$0xff]  }
 0x1b1   :  { %v3214_v57 = vld [vmem:[#allocation9 + $0x18] sm:$0xff]  }
 0x1b2   :  { %1161 = vmatpush1.bf16.msra.mxu0 %v2813_v12  ;;  %1204 = vmatpush1.bf16.msra.mxu1 %v2815_v13  ;;  %v201_v12 = vld [vmem:[#allocation7 + $0x238] sm:$0xff] }
 0x1b3   :  { %1162 = vmatprep.subr.bf16.mxu0 %v2830_v14  ;;  %1205 = vmatprep.subr.bf16.mxu1 %v2832_v16  ;;  %v209_v13 = vld [vmem:[#allocation7 + $0x278] sm:$0xff]  ;;  %v2817_v14 = vcombine.low %v184_v0, %v192_v1  ;;  %v2819_v16 = vcombine.low %v185_v2, %v193_v3  ;;  %v3222_v0 = vld [vmem:[#allocation9 + $0x28] sm:$0xff]   ;;  %v3224_v2 = vld [vmem:[#allocation9 + $0x70] sm:$0xff]  }
 0x1b4   :  { %v3223_v1 = vld [vmem:[#allocation9 + $0xa8] sm:$0xff]   ;;  %v3225_v3 = vld [vmem:[#allocation9 + $0xf0] sm:$0xff]  }
 0x1b6   :  { %1163 = vmatpush1.bf16.msra.mxu0 %v2829_v21  ;;  %1206 = vmatpush1.bf16.msra.mxu1 %v2831_v22  ;;  %v225_v21 = vld [vmem:[#allocation7 + $0x2f8] sm:$0xff]  ;;  %v2833_v22 = vcombine.low %v200_v10, %v208_v11 }
 0x1b7   :  { %1164 = vmatprep.subr.bf16.mxu0 %v2846_v23  ;;  %1207 = vmatprep.subr.bf16.mxu1 %v2848_v24  ;;  %v2835_v23 = vcombine.low %v201_v12, %v209_v13  ;;  %v2850_v24 = vcombine.high %v216_v18, %v224_v19  ;;  %v2852_v25 = vcombine.high %v217_v20, %v225_v21  ;;  %v3230_v10 = vld [vmem:[#allocation9 + $0x38] sm:$0xff]  }
 0x1b8   :  { %v3231_v11 = vld [vmem:[#allocation9 + $0xb8] sm:$0xff]  }
 0x1ba   :  { %1165 = vmatpush1.bf16.msra.mxu0 %v2845_v29  ;;  %1208 = vmatpush1.bf16.msra.mxu1 %v2847_v30  ;;  %v241_v29 = vld [vmem:[#allocation7 + $0x378] sm:$0xff]  ;;  %v2849_v30 = vcombine.low %v216_v18, %v224_v19  ;;  %v3582_v18 = vld [vmem:[%s3666_s5] sm:$0xff] }
 0x1bb   :  { %1166 = vmatprep.subr.bf16.mxu0 %v2862_v31  ;;  %1209 = vmatprep.subr.bf16.mxu1 %v2864_v32  ;;  %v2851_v31 = vcombine.low %v217_v20, %v225_v21  ;;  %v2866_v32 = vcombine.high %v232_v26, %v240_v27  ;;  %v2868_v33 = vcombine.high %v233_v28, %v241_v29 }
 0x1be   :  { %1167 = vmatpush1.bf16.msra.mxu0 %v2861_v37  ;;  %1210 = vmatpush1.bf16.msra.mxu1 %v2863_v38  ;;  %v257_v37 = vld [vmem:[#allocation7 + $0x3f8] sm:$0xff]  ;;  %v2865_v38 = vcombine.low %v232_v26, %v240_v27 }
 0x1bf   :  { %1168 = vmatprep.subr.bf16.mxu0 %v2878_v39  ;;  %1211 = vmatprep.subr.bf16.mxu1 %v2880_v40  ;;  %v2867_v39 = vcombine.low %v233_v28, %v241_v29  ;;  %v2882_v40 = vcombine.high %v248_v34, %v256_v35  ;;  %v2884_v41 = vcombine.high %v249_v36, %v257_v37 }
 0x1c0   :  { %v2883_v43 = vcombine.low %v249_v36, %v257_v37 }
 0x1c2   :  { %1169 = vmatpush1.bf16.msra.mxu0 %v2877_v45  ;;  %1212 = vmatpush1.bf16.msra.mxu1 %v2879_v46  ;;  %v3201_v45 = vld [vmem:[#allocation9 + $0xc0] sm:$0xff]  }
 0x1c3   :  { %1240 = vmatprep.subr.bf16.mxu0 %v2770_v47  ;;  %1283 = vmatprep.subr.bf16.mxu1 %v2772_v48  ;;  %v3202_v46 = vld [vmem:[#allocation9] sm:$0xff]   ;;  %v3204_v48 = vld [vmem:[#allocation9 + $0x48] sm:$0xff]  }
 0x1c4   :  { %v3203_v47 = vld [vmem:[#allocation9 + $0x80] sm:$0xff]  }
 0x1c5   :  { %1187 = vmatmul.mubr.bf16.vlgmr.msra.gmra.mrb[8].mxu0 %v3559_v4  ;;  %1230 = vmatmul.mubr.bf16.vlgmr.msra.gmra.mrb[8].mxu1 %v3559_v4 }
 0x1c6   :  { %1241 = vmatpush1.bf16.msra.mxu0 %v2769_v53  ;;  %1284 = vmatpush1.bf16.msra.mxu1 %v2771_v54  ;;  %v3209_v53 = vld [vmem:[#allocation9 + $0xd0] sm:$0xff]  }
 0x1c7   :  { %1242 = vmatprep.subr.bf16.mxu0 %v2786_v55  ;;  %1285 = vmatprep.subr.bf16.mxu1 %v2788_v56  ;;  %v3210_v54 = vld [vmem:[#allocation9 + $0x10] sm:$0xff]   ;;  %v3212_v56 = vld [vmem:[#allocation9 + $0x58] sm:$0xff]  }
 0x1c8   :  { %1272 = vmatprep.mubr.bf16.mxu0 %v3440_v15  ;;  %1315 = vmatprep.mubr.bf16.mxu1 %v3440_v15  ;;  %v2836_v15 = vcombine.high %v201_v12, %v209_v13  ;;  %v3211_v55 = vld [vmem:[#allocation9 + $0x90] sm:$0xff]   ;;  %v3232_v12 = vld [vmem:[#allocation9 + $0x140] sm:$0xff]  }
 0x1c9   :  { %v3233_v13 = vld [vmem:[#allocation9 + $0x1c0] sm:$0xff]  }
 0x1ca   :  { %1243 = vmatpush1.bf16.msra.mxu0 %v2785_v60  ;;  %1286 = vmatpush1.bf16.msra.mxu1 %v2787_v61  ;;  %v3218_v60 = vld [vmem:[#allocation9 + $0x20] sm:$0xff]  }
 0x1cb   :  { %1244 = vmatprep.subr.bf16.mxu0 %v2802_v62  ;;  %1287 = vmatprep.subr.bf16.mxu1 %v2804_v63  ;;  %v3219_v61 = vld [vmem:[#allocation9 + $0xa0] sm:$0xff]   ;;  %v3220_v62 = vld [vmem:[#allocation9 + $0x68] sm:$0xff]  }
 0x1cc   :  { %v3221_v63 = vld [vmem:[#allocation9 + $0xe8] sm:$0xff]  }
 0x1ce   :  { %1245 = vmatpush1.bf16.msra.mxu0 %v2801_v5  ;;  %1288 = vmatpush1.bf16.msra.mxu1 %v2803_v6  ;;  %v3226_v5 = vld [vmem:[#allocation9 + $0x30] sm:$0xff]  }
 0x1cf   :  { %1246 = vmatprep.subr.bf16.mxu0 %v2818_v7  ;;  %1289 = vmatprep.subr.bf16.mxu1 %v2820_v9  ;;  %v3227_v6 = vld [vmem:[#allocation9 + $0xb0] sm:$0xff]   ;;  %v3228_v7 = vld [vmem:[#allocation9 + $0x78] sm:$0xff]  }
 0x1d0   :  { %v3229_v9 = vld [vmem:[#allocation9 + $0xf8] sm:$0xff]  }
 0x1d2   :  { %1247 = vmatpush1.bf16.msra.mxu0 %v2817_v14  ;;  %1290 = vmatpush1.bf16.msra.mxu1 %v2819_v16  ;;  %v262_v14 = vlaneseq }
 0x1d3   :  { %1248 = vmatprep.subr.bf16.mxu0 %v2834_v17  ;;  %1291 = vmatprep.subr.bf16.mxu1 %v2836_v15 }
 0x1d4   :  { %v3575_v16 = vshrl.u32 %v262_v14, 7  ;;  %v3255_v14 = vld [vmem:[#allocation9 + $0x1a8] sm:$0xff]  }
 0x1d6   :  { %1249 = vmatpush1.bf16.msra.mxu0 %v2833_v22  ;;  %1292 = vmatpush1.bf16.msra.mxu1 %v2835_v23  ;;  %v264_v17 = vsub.s32 0, %v3575_v16  ;;  %v272_v15 = vsub.s32 2, %v3575_v16  ;;  %v268_v19 = vsub.s32 1, %v3575_v16  ;;  %v276_v20 = vsub.s32 3, %v3575_v16 }
 0x1d7   :  { %1250 = vmatprep.subr.bf16.mxu0 %v2850_v24  ;;  %1293 = vmatprep.subr.bf16.mxu1 %v2852_v25 }
 0x1d8   :  { %v265_v21 = vrot.slane %v3582_v18, %v264_v17  ;;  %v273_v22 = vrot.slane %v3582_v18, %v272_v15  ;;  %v269_v23 = vrot.slane %v3582_v18, %v268_v19  ;;  %v277_v24 = vrot.slane %v3582_v18, %v276_v20 }
 0x1da   :  { %1251 = vmatpush1.bf16.msra.mxu0 %v2849_v30  ;;  %1294 = vmatpush1.bf16.msra.mxu1 %v2851_v31 }
 0x1db   :  { %1252 = vmatprep.subr.bf16.mxu0 %v2866_v32  ;;  %1295 = vmatprep.subr.bf16.mxu1 %v2868_v33 }
 0x1de   :  { %1253 = vmatpush1.bf16.msra.mxu0 %v2865_v38  ;;  %1296 = vmatpush1.bf16.msra.mxu1 %v2867_v39 }
 0x1df   :  { %1254 = vmatprep.subr.bf16.mxu0 %v2882_v40  ;;  %1297 = vmatprep.subr.bf16.mxu1 %v2884_v41 }
 0x1e2   :  { %1255 = vmatpush1.bf16.msra.mxu0 %v2881_v42  ;;  %1298 = vmatpush1.bf16.msra.mxu1 %v2883_v43 }
 0x1e3   :  { %3014 = vmatprep.subr.bf16.mxu0 %v3200_v44  ;;  %3036 = vmatprep.subr.bf16.mxu1 %v3201_v45 }
 0x1e5   :  { %1273 = vmatmul.mubr.bf16.vlgmr.msra.gmra.mrb[12].mxu0 %v3559_v4  ;;  %1316 = vmatmul.mubr.bf16.vlgmr.msra.gmra.mrb[12].mxu1 %v3559_v4  ;;  %v3215_v4 = vld [vmem:[#allocation9 + $0x98] sm:$0xff]  }
 0x1e6   :  { %3015 = vmatpush3.bf16.msra.mxu0 %v3202_v46  ;;  %3037 = vmatpush3.bf16.msra.mxu1 %v3203_v47 }
 0x1e7   :  { %3016 = vmatprep.subr.bf16.mxu0 %v3204_v48  ;;  %3038 = vmatprep.subr.bf16.mxu1 %v3205_v49 }
 0x1ea   :  { %3017 = vmatpush3.bf16.msra.mxu0 %v3206_v50  ;;  %3039 = vmatpush3.bf16.msra.mxu1 %v3207_v51 }
 0x1eb   :  { %3018 = vmatprep.subr.bf16.mxu0 %v3208_v52  ;;  %3040 = vmatprep.subr.bf16.mxu1 %v3209_v53  ;;  %v3234_v53 = vld [vmem:[#allocation9 + $0x100] sm:$0xff]  }
 0x1ee   :  { %3019 = vmatpush3.bf16.msra.mxu0 %v3210_v54  ;;  %3041 = vmatpush3.bf16.msra.mxu1 %v3211_v55  ;;  %v3235_v54 = vld [vmem:[#allocation9 + $0x180] sm:$0xff]   ;;  %v3236_v55 = vld [vmem:[#allocation9 + $0x148] sm:$0xff]  }
 0x1ef   :  { %3020 = vmatprep.subr.bf16.mxu0 %v3212_v56  ;;  %3042 = vmatprep.subr.bf16.mxu1 %v3213_v8  ;;  %v3237_v56 = vld [vmem:[#allocation9 + $0x1c8] sm:$0xff]  }
 0x1f0   :  { %v3238_v8 = vld [vmem:[#allocation9 + $0x108] sm:$0xff]  }
 0x1f2   :  { %3021 = vmatpush3.bf16.msra.mxu0 %v3214_v57  ;;  %3043 = vmatpush3.bf16.msra.mxu1 %v3215_v4  ;;  %v3239_v57 = vld [vmem:[#allocation9 + $0x188] sm:$0xff]   ;;  %v3240_v4 = vld [vmem:[#allocation9 + $0x150] sm:$0xff]  }
 0x1f3   :  { %3022 = vmatprep.subr.bf16.mxu0 %v3216_v58  ;;  %3044 = vmatprep.subr.bf16.mxu1 %v3217_v59  ;;  %v3241_v58 = vld [vmem:[#allocation9 + $0x1d0] sm:$0xff]  }
 0x1f4   :  { %v3242_v59 = vld [vmem:[#allocation9 + $0x110] sm:$0xff]  }
 0x1f6   :  { %3023 = vmatpush3.bf16.msra.mxu0 %v3218_v60  ;;  %3045 = vmatpush3.bf16.msra.mxu1 %v3219_v61  ;;  %v3243_v60 = vld [vmem:[#allocation9 + $0x190] sm:$0xff]   ;;  %v3244_v61 = vld [vmem:[#allocation9 + $0x158] sm:$0xff]  }
 0x1f7   :  { %3024 = vmatprep.subr.bf16.mxu0 %v3220_v62  ;;  %3046 = vmatprep.subr.bf16.mxu1 %v3221_v63  ;;  %v3245_v62 = vld [vmem:[#allocation9 + $0x1d8] sm:$0xff]  }
 0x1f8   :  { %v3246_v63 = vld [vmem:[#allocation9 + $0x118] sm:$0xff]  }
 0x1fa   :  { %3025 = vmatpush3.bf16.msra.mxu0 %v3222_v0  ;;  %3047 = vmatpush3.bf16.msra.mxu1 %v3223_v1  ;;  %v3247_v0 = vld [vmem:[#allocation9 + $0x198] sm:$0xff]   ;;  %v3248_v1 = vld [vmem:[#allocation9 + $0x160] sm:$0xff]  }
 0x1fb   :  { %3026 = vmatprep.subr.bf16.mxu0 %v3224_v2  ;;  %3048 = vmatprep.subr.bf16.mxu1 %v3225_v3  ;;  %v3249_v2 = vld [vmem:[#allocation9 + $0x1e0] sm:$0xff]  }
 0x1fc   :  { %v3250_v3 = vld [vmem:[#allocation9 + $0x120] sm:$0xff]  }
 0x1fe   :  { %3027 = vmatpush3.bf16.msra.mxu0 %v3226_v5  ;;  %3049 = vmatpush3.bf16.msra.mxu1 %v3227_v6  ;;  %v3251_v5 = vld [vmem:[#allocation9 + $0x1a0] sm:$0xff]   ;;  %v3252_v6 = vld [vmem:[#allocation9 + $0x168] sm:$0xff]  }
 0x1ff   :  { %3028 = vmatprep.subr.bf16.mxu0 %v3228_v7  ;;  %3050 = vmatprep.subr.bf16.mxu1 %v3229_v9  ;;  %v3253_v7 = vld [vmem:[#allocation9 + $0x1e8] sm:$0xff]   ;;  %v280_v9 = vsub.s32 4, %v3575_v16 }
 0x202   :  { %3029 = vmatpush3.bf16.msra.mxu0 %v3230_v10  ;;  %3051 = vmatpush3.bf16.msra.mxu1 %v3231_v11  ;;  %v288_v10 = vsub.s32 6, %v3575_v16  ;;  %v284_v11 = vsub.s32 5, %v3575_v16 }
 0x203   :  { %3058 = vmatprep.subr.bf16.mxu0 %v3232_v12  ;;  %3080 = vmatprep.subr.bf16.mxu1 %v3233_v13  ;;  %v292_v12 = vsub.s32 7, %v3575_v16  ;;  %v3254_v13 = vld [vmem:[#allocation9 + $0x128] sm:$0xff]  }
 0x258   :  { %v1016_v25 = vpop.f32.mrb[0].mxu0  ;;  %v1059_v26 = vpop.f32.mrb[0].mxu1 }
 0x259   :  { %v1017_v27 = vadd.f32 %v1016_v25, %v265_v21  ;;  %v1060_v28 = vadd.f32 %v1059_v26, %v273_v22  ;;  %v1018_v29 = vpop.f32.mrb[1].mxu0  ;;  %v1061_v30 = vpop.f32.mrb[1].mxu1  ;;  %v285_v25 = vrot.slane %v3582_v18, %v284_v11  ;;  %v293_v26 = vrot.slane %v3582_v18, %v292_v12 }
 0x25a   :  { %v1019_v31 = vadd.f32 %v1018_v29, %v269_v23  ;;  %v1062_v32 = vadd.f32 %v1061_v30, %v277_v24  ;;  %v1020_v33 = vpop.f32.mrb[2].mxu0  ;;  %v1063_v34 = vpop.f32.mrb[2].mxu1  ;;  %v3258_v29 = vld [vmem:[#allocation9 + $0x130] sm:$0xff]  }
 0x25b   :  { %v1021_v35 = vadd.f32 %v1020_v33, %v265_v21  ;;  %v1064_v36 = vadd.f32 %v1063_v34, %v273_v22  ;;  %v1022_v37 = vpop.f32.mrb[3].mxu0  ;;  %v1065_v38 = vpop.f32.mrb[3].mxu1  ;;  %v1326_v41 = vmax.f32 %v1017_v27, 0.0  ;;  %v1328_v42 = vmax.f32 %v1060_v28, 0.0  ;;  %v3259_v30 = vld [vmem:[#allocation9 + $0x1b0] sm:$0xff]  }
 0x25c   :  { %v1023_v39 = vadd.f32 %v1022_v37, %v269_v23  ;;  %v1066_v40 = vadd.f32 %v1065_v38, %v277_v24  ;;  %v1327_v45 = vmax.f32 %v1019_v31, 0.0  ;;  %v1329_v46 = vmax.f32 %v1062_v32, 0.0  ;;  %v3256_v23 = vld [vmem:[#allocation9 + $0x170] sm:$0xff]  }
 0x25d   :  { %v1342_v43 = vmax.f32 %v1021_v35, 0.0  ;;  %v1344_v44 = vmax.f32 %v1064_v36, 0.0  ;;  %v281_v21 = vrot.slane %v3582_v18, %v280_v9  ;;  %v289_v22 = vrot.slane %v3582_v18, %v288_v10  ;;  %v3257_v24 = vld [vmem:[#allocation9 + $0x1f0] sm:$0xff]   ;;  %v3260_v35 = vld [vmem:[#allocation9 + $0x178] sm:$0xff]  }
 0x25e   :  { %v1343_v47 = vmax.f32 %v1023_v39, 0.0  ;;  %v1345_v48 = vmax.f32 %v1066_v40, 0.0  ;;  %v3261_v36 = vld [vmem:[#allocation9 + $0x1f8] sm:$0xff]  }
 0x25f   :  { %v1358_v49 = vpack.c.bf16 %v1342_v43, %v1326_v41  ;;  %v1360_v50 = vpack.c.bf16 %v1344_v44, %v1328_v42 }
 0x260   :  { %v1359_v51 = vpack.c.bf16 %v1343_v47, %v1327_v45  ;;  %v1361_v52 = vpack.c.bf16 %v1345_v48, %v1329_v46  ;;  %v3262_v46 = vld [vmem:[#allocation9 + $0x138] sm:$0xff]  }
 0x261   :  { %v3263_v47 = vld [vmem:[#allocation9 + $0x1b8] sm:$0xff]  }
 0x262   :  { %2437 = vmatprep.mubr.bf16.mxu0 %v1359_v51  ;;  %2478 = vmatprep.mubr.bf16.mxu1 %v1361_v52  ;;  %v3264_v52 = vld [vmem:[#allocation9 + $0x240] sm:$0xff]  }
 0x263   :  { %2438 = vmatmul.mubr.bf16.vlgmr.msra.gmra.mrb[16].mxu0 %v1358_v49  ;;  %2479 = vmatmul.mubr.bf16.vlgmr.msra.gmra.mrb[16].mxu1 %v1360_v50 }
 0x264   :  { %3059 = vmatpush3.bf16.msra.mxu0 %v3234_v53  ;;  %3081 = vmatpush3.bf16.msra.mxu1 %v3235_v54  ;;  %v3265_v53 = vld [vmem:[#allocation9 + $0x2c0] sm:$0xff]  }
 0x265   :  { %3060 = vmatprep.subr.bf16.mxu0 %v3236_v55  ;;  %3082 = vmatprep.subr.bf16.mxu1 %v3237_v56 }
 0x268   :  { %3061 = vmatpush3.bf16.msra.mxu0 %v3238_v8  ;;  %3083 = vmatpush3.bf16.msra.mxu1 %v3239_v57 }
 0x269   :  { %3062 = vmatprep.subr.bf16.mxu0 %v3240_v4  ;;  %3084 = vmatprep.subr.bf16.mxu1 %v3241_v58 }
 0x26c   :  { %3063 = vmatpush3.bf16.msra.mxu0 %v3242_v59  ;;  %3085 = vmatpush3.bf16.msra.mxu1 %v3243_v60  ;;  %v3266_v60 = vld [vmem:[#allocation9 + $0x200] sm:$0xff]  }
 0x26d   :  { %3064 = vmatprep.subr.bf16.mxu0 %v3244_v61  ;;  %3086 = vmatprep.subr.bf16.mxu1 %v3245_v62  ;;  %v3267_v61 = vld [vmem:[#allocation9 + $0x280] sm:$0xff]   ;;  %v3268_v62 = vld [vmem:[#allocation9 + $0x248] sm:$0xff]  }
 0x270   :  { %3065 = vmatpush3.bf16.msra.mxu0 %v3246_v63  ;;  %3087 = vmatpush3.bf16.msra.mxu1 %v3247_v0  ;;  %v3269_v63 = vld [vmem:[#allocation9 + $0x2c8] sm:$0xff]  }
 0x271   :  { %3066 = vmatprep.subr.bf16.mxu0 %v3248_v1  ;;  %3088 = vmatprep.subr.bf16.mxu1 %v3249_v2  ;;  %v3270_v0 = vld [vmem:[#allocation9 + $0x208] sm:$0xff]   ;;  %v3272_v2 = vld [vmem:[#allocation9 + $0x250] sm:$0xff]  }
 0x272   :  { %v3271_v1 = vld [vmem:[#allocation9 + $0x288] sm:$0xff]  }
 0x274   :  { %3067 = vmatpush3.bf16.msra.mxu0 %v3250_v3  ;;  %3089 = vmatpush3.bf16.msra.mxu1 %v3251_v5  ;;  %v3273_v3 = vld [vmem:[#allocation9 + $0x2d0] sm:$0xff]  }
 0x275   :  { %3068 = vmatprep.subr.bf16.mxu0 %v3252_v6  ;;  %3090 = vmatprep.subr.bf16.mxu1 %v3253_v7  ;;  %v3274_v5 = vld [vmem:[#allocation9 + $0x210] sm:$0xff]   ;;  %v3276_v7 = vld [vmem:[#allocation9 + $0x258] sm:$0xff]  }
 0x276   :  { %v3275_v6 = vld [vmem:[#allocation9 + $0x290] sm:$0xff]  }
 0x278   :  { %v1102_v27 = vpop.f32.mrb[4].mxu0  ;;  %v1145_v28 = vpop.f32.mrb[4].mxu1  ;;  %3069 = vmatpush3.bf16.msra.mxu0 %v3254_v13  ;;  %3091 = vmatpush3.bf16.msra.mxu1 %v3255_v14  ;;  %v3277_v13 = vld [vmem:[#allocation9 + $0x2d8] sm:$0xff]  }
 0x279   :  { %v1103_v31 = vadd.f32 %v1102_v27, %v281_v21  ;;  %v1146_v32 = vadd.f32 %v1145_v28, %v289_v22  ;;  %v1104_v33 = vpop.f32.mrb[5].mxu0  ;;  %v1147_v34 = vpop.f32.mrb[5].mxu1  ;;  %3070 = vmatprep.subr.bf16.mxu0 %v3256_v23  ;;  %3092 = vmatprep.subr.bf16.mxu1 %v3257_v24  ;;  %v3278_v14 = vld [vmem:[#allocation9 + $0x218] sm:$0xff]   ;;  %v3281_v23 = vld [vmem:[#allocation9 + $0x2e0] sm:$0xff]   ;;  %v3285_v27 = vld [vmem:[#allocation9 + $0x2e8] sm:$0xff]  }
 0x27a   :  { %v1105_v37 = vadd.f32 %v1104_v33, %v285_v25  ;;  %v1148_v38 = vadd.f32 %v1147_v34, %v293_v26  ;;  %v1106_v39 = vpop.f32.mrb[6].mxu0  ;;  %v1149_v40 = vpop.f32.mrb[6].mxu1  ;;  %v3282_v24 = vld [vmem:[#allocation9 + $0x220] sm:$0xff]   ;;  %v3617_v28 = vld [vmem:[%s3666_s5 + $0x8] sm:$0xff]  ;;  %v3288_v33 = vld [vmem:[#allocation9 + $0x270] sm:$0xff]  }
 0x27b   :  { %v1107_v41 = vadd.f32 %v1106_v39, %v281_v21  ;;  %v1150_v18 = vadd.f32 %v1149_v40, %v289_v22  ;;  %v1108_v42 = vpop.f32.mrb[7].mxu0  ;;  %v1151_v43 = vpop.f32.mrb[7].mxu1  ;;  %v1330_v48 = vmax.f32 %v1103_v31, 0.0  ;;  %v1332_v49 = vmax.f32 %v1146_v32, 0.0  ;;  %v3279_v21 = vld [vmem:[#allocation9 + $0x298] sm:$0xff]   ;;  %v3280_v22 = vld [vmem:[#allocation9 + $0x260] sm:$0xff]  }
 0x27c   :  { %v1109_v44 = vadd.f32 %v1108_v42, %v285_v25  ;;  %v1152_v45 = vadd.f32 %v1151_v43, %v293_v26  ;;  %3071 = vmatpush3.bf16.msra.mxu0 %v3258_v29  ;;  %3093 = vmatpush3.bf16.msra.mxu1 %v3259_v30  ;;  %v1331_v54 = vmax.f32 %v1105_v37, 0.0  ;;  %v1333_v55 = vmax.f32 %v1148_v38, 0.0  ;;  %v3283_v25 = vld [vmem:[#allocation9 + $0x2a0] sm:$0xff]   ;;  %v3284_v26 = vld [vmem:[#allocation9 + $0x268] sm:$0xff]   ;;  %v3289_v34 = vld [vmem:[#allocation9 + $0x2f0] sm:$0xff]  }
 0x27d   :  { %v1346_v50 = vmax.f32 %v1107_v41, 0.0  ;;  %v1348_v51 = vmax.f32 %v1150_v18, 0.0  ;;  %3072 = vmatprep.subr.bf16.mxu0 %v3260_v35  ;;  %3094 = vmatprep.subr.bf16.mxu1 %v3261_v36  ;;  %v3286_v29 = vld [vmem:[#allocation9 + $0x228] sm:$0xff]   ;;  %v297_v31 = vrot.slane %v3617_v28, %v264_v17  ;;  %v305_v32 = vrot.slane %v3617_v28, %v272_v15  ;;  %v3290_v39 = vld [vmem:[#allocation9 + $0x230] sm:$0xff]   ;;  %v3292_v42 = vld [vmem:[#allocation9 + $0x278] sm:$0xff]  }
 0x27e   :  { %v1347_v56 = vmax.f32 %v1109_v44, 0.0  ;;  %v1349_v8 = vmax.f32 %v1152_v45, 0.0  ;;  %v3287_v30 = vld [vmem:[#allocation9 + $0x2a8] sm:$0xff]   ;;  %v301_v35 = vrot.slane %v3617_v28, %v268_v19  ;;  %v309_v36 = vrot.slane %v3617_v28, %v276_v20  ;;  %v3291_v17 = vld [vmem:[#allocation9 + $0x2b0] sm:$0xff]   ;;  %v3293_v43 = vld [vmem:[#allocation9 + $0x2f8] sm:$0xff]  }
 0x27f   :  { %v1362_v57 = vpack.c.bf16 %v1346_v50, %v1330_v48  ;;  %v1364_v4 = vpack.c.bf16 %v1348_v51, %v1332_v49 }
 0x280   :  { %v1363_v58 = vpack.c.bf16 %v1347_v56, %v1331_v54  ;;  %v1365_v59 = vpack.c.bf16 %v1349_v8, %v1333_v55  ;;  %3073 = vmatpush3.bf16.msra.mxu0 %v3262_v46  ;;  %3095 = vmatpush3.bf16.msra.mxu1 %v3263_v47 }
 0x281   :  { %3102 = vmatprep.subr.bf16.mxu0 %v3264_v52  ;;  %3124 = vmatprep.subr.bf16.mxu1 %v3265_v53  ;;  %v3294_v52 = vld [vmem:[#allocation9 + $0x238] sm:$0xff]  }
 0x282   :  { %2519 = vmatprep.mubr.bf16.mxu0 %v1363_v58  ;;  %2560 = vmatprep.mubr.bf16.mxu1 %v1365_v59  ;;  %v3295_v53 = vld [vmem:[#allocation9 + $0x2b8] sm:$0xff]  }
 0x283   :  { %2520 = vmatmul.mubr.bf16.vlgmr.msra.gmra.mrb[20].mxu0 %v1362_v57  ;;  %2561 = vmatmul.mubr.bf16.vlgmr.msra.gmra.mrb[20].mxu1 %v1364_v4  ;;  %v3296_v57 = vld [vmem:[#allocation9 + $0x340] sm:$0xff]  }
 0x284   :  { %3103 = vmatpush3.bf16.msra.mxu0 %v3266_v60  ;;  %3125 = vmatpush3.bf16.msra.mxu1 %v3267_v61  ;;  %v3297_v4 = vld [vmem:[#allocation9 + $0x3c0] sm:$0xff]  }
 0x285   :  { %3104 = vmatprep.subr.bf16.mxu0 %v3268_v62  ;;  %3126 = vmatprep.subr.bf16.mxu1 %v3269_v63 }
 0x288   :  { %3105 = vmatpush3.bf16.msra.mxu0 %v3270_v0  ;;  %3127 = vmatpush3.bf16.msra.mxu1 %v3271_v1 }
 0x289   :  { %3106 = vmatprep.subr.bf16.mxu0 %v3272_v2  ;;  %3128 = vmatprep.subr.bf16.mxu1 %v3273_v3  ;;  %v3298_v2 = vld [vmem:[#allocation9 + $0x300] sm:$0xff]  }
 0x28a   :  { %v3299_v3 = vld [vmem:[#allocation9 + $0x380] sm:$0xff]  }
 0x28c   :  { %3107 = vmatpush3.bf16.msra.mxu0 %v3274_v5  ;;  %3129 = vmatpush3.bf16.msra.mxu1 %v3275_v6  ;;  %v3300_v5 = vld [vmem:[#allocation9 + $0x348] sm:$0xff]  }
 0x28d   :  { %3108 = vmatprep.subr.bf16.mxu0 %v3276_v7  ;;  %3130 = vmatprep.subr.bf16.mxu1 %v3277_v13  ;;  %v3301_v6 = vld [vmem:[#allocation9 + $0x3c8] sm:$0xff]  }
 0x28e   :  { %v3302_v7 = vld [vmem:[#allocation9 + $0x308] sm:$0xff]  }
 0x28f   :  { %v3303_v13 = vld [vmem:[#allocation9 + $0x388] sm:$0xff]  }
 0x290   :  { %3109 = vmatpush3.bf16.msra.mxu0 %v3278_v14  ;;  %3131 = vmatpush3.bf16.msra.mxu1 %v3279_v21  ;;  %v3304_v14 = vld [vmem:[#allocation9 + $0x350] sm:$0xff]  }
 0x291   :  { %3110 = vmatprep.subr.bf16.mxu0 %v3280_v22  ;;  %3132 = vmatprep.subr.bf16.mxu1 %v3281_v23  ;;  %v3305_v21 = vld [vmem:[#allocation9 + $0x3d0] sm:$0xff]  }
 0x292   :  { %v3306_v22 = vld [vmem:[#allocation9 + $0x310] sm:$0xff]  }
 0x293   :  { %v3307_v23 = vld [vmem:[#allocation9 + $0x390] sm:$0xff]  }
 0x294   :  { %3111 = vmatpush3.bf16.msra.mxu0 %v3282_v24  ;;  %3133 = vmatpush3.bf16.msra.mxu1 %v3283_v25  ;;  %v3308_v24 = vld [vmem:[#allocation9 + $0x358] sm:$0xff]  }
 0x295   :  { %3112 = vmatprep.subr.bf16.mxu0 %v3284_v26  ;;  %3134 = vmatprep.subr.bf16.mxu1 %v3285_v27  ;;  %v3309_v25 = vld [vmem:[#allocation9 + $0x3d8] sm:$0xff]  }
 0x296   :  { %v3310_v26 = vld [vmem:[#allocation9 + $0x318] sm:$0xff]  }
 0x297   :  { %v3311_v27 = vld [vmem:[#allocation9 + $0x398] sm:$0xff]  }
 0x298   :  { %v1188_v37 = vpop.f32.mrb[8].mxu0  ;;  %v1231_v38 = vpop.f32.mrb[8].mxu1  ;;  %3113 = vmatpush3.bf16.msra.mxu0 %v3286_v29  ;;  %3135 = vmatpush3.bf16.msra.mxu1 %v3287_v30  ;;  %v3312_v29 = vld [vmem:[#allocation9 + $0x360] sm:$0xff]  }
 0x299   :  { %v1189_v40 = vadd.f32 %v1188_v37, %v297_v31  ;;  %v1232_v41 = vadd.f32 %v1231_v38, %v305_v32  ;;  %v1190_v18 = vpop.f32.mrb[9].mxu0  ;;  %v1233_v15 = vpop.f32.mrb[9].mxu1  ;;  %3114 = vmatprep.subr.bf16.mxu0 %v3288_v33  ;;  %3136 = vmatprep.subr.bf16.mxu1 %v3289_v34  ;;  %v3313_v30 = vld [vmem:[#allocation9 + $0x3e0] sm:$0xff]   ;;  %v3316_v33 = vld [vmem:[#allocation9 + $0x368] sm:$0xff]   ;;  %v313_v37 = vrot.slane %v3617_v28, %v280_v9  ;;  %v3323_v9 = vld [vmem:[#allocation9 + $0x3b0] sm:$0xff]  }
 0x29a   :  { %v1191_v44 = vadd.f32 %v1190_v18, %v301_v35  ;;  %v1234_v19 = vadd.f32 %v1233_v15, %v309_v36  ;;  %v1192_v45 = vpop.f32.mrb[10].mxu0  ;;  %v1235_v46 = vpop.f32.mrb[10].mxu1  ;;  %v3317_v34 = vld [vmem:[#allocation9 + $0x3e8] sm:$0xff]   ;;  %v321_v38 = vrot.slane %v3617_v28, %v288_v10 }
 0x29b   :  { %v1193_v47 = vadd.f32 %v1192_v45, %v297_v31  ;;  %v1236_v20 = vadd.f32 %v1235_v46, %v305_v32  ;;  %v1194_v48 = vpop.f32.mrb[11].mxu0  ;;  %v1237_v49 = vpop.f32.mrb[11].mxu1  ;;  %v1334_v54 = vmax.f32 %v1189_v40, 0.0  ;;  %v1336_v55 = vmax.f32 %v1232_v41, 0.0  ;;  %v3314_v31 = vld [vmem:[#allocation9 + $0x320] sm:$0xff]   ;;  %v3324_v45 = vld [vmem:[#allocation9 + $0x378] sm:$0xff]  }
 0x29c   :  { %v1195_v50 = vadd.f32 %v1194_v48, %v301_v35  ;;  %v1238_v51 = vadd.f32 %v1237_v49, %v309_v36  ;;  %3115 = vmatpush3.bf16.msra.mxu0 %v3290_v39  ;;  %3137 = vmatpush3.bf16.msra.mxu1 %v3291_v17  ;;  %v1335_v58 = vmax.f32 %v1191_v44, 0.0  ;;  %v1337_v59 = vmax.f32 %v1234_v19, 0.0  ;;  %v3315_v32 = vld [vmem:[#allocation9 + $0x3a0] sm:$0xff]   ;;  %v3318_v35 = vld [vmem:[#allocation9 + $0x328] sm:$0xff]   ;;  %v3320_v39 = vld [vmem:[#allocation9 + $0x370] sm:$0xff]  }
 0x29d   :  { %v1350_v56 = vmax.f32 %v1193_v47, 0.0  ;;  %v1352_v8 = vmax.f32 %v1236_v20, 0.0  ;;  %3116 = vmatprep.subr.bf16.mxu0 %v3292_v42  ;;  %3138 = vmatprep.subr.bf16.mxu1 %v3293_v43  ;;  %v3319_v36 = vld [vmem:[#allocation9 + $0x3a8] sm:$0xff]   ;;  %v3321_v17 = vld [vmem:[#allocation9 + $0x3f0] sm:$0xff]   ;;  %v317_v40 = vrot.slane %v3617_v28, %v284_v11  ;;  %v325_v41 = vrot.slane %v3617_v28, %v292_v12  ;;  %v3325_v46 = vld [vmem:[#allocation9 + $0x3f8] sm:$0xff]  }
 0x29e   :  { %v1351_v60 = vmax.f32 %v1195_v50, 0.0  ;;  %v1353_v61 = vmax.f32 %v1238_v51, 0.0  ;;  %v3322_v42 = vld [vmem:[#allocation9 + $0x330] sm:$0xff]  }
 0x29f   :  { %v1366_v62 = vpack.c.bf16 %v1350_v56, %v1334_v54  ;;  %v1368_v63 = vpack.c.bf16 %v1352_v8, %v1336_v55 }
 0x2a0   :  { %v1367_v0 = vpack.c.bf16 %v1351_v60, %v1335_v58  ;;  %v1369_v1 = vpack.c.bf16 %v1353_v61, %v1337_v59  ;;  %3117 = vmatpush3.bf16.msra.mxu0 %v3294_v52  ;;  %3139 = vmatpush3.bf16.msra.mxu1 %v3295_v53  ;;  %v3326_v52 = vld [vmem:[#allocation9 + $0x338] sm:$0xff]  }
 0x2a1   :  { %3146 = vmatprep.subr.bf16.mxu0 %v3296_v57  ;;  %3168 = vmatprep.subr.bf16.mxu1 %v3297_v4  ;;  %v3327_v53 = vld [vmem:[#allocation9 + $0x3b8] sm:$0xff]  }
 0x2a2   :  { %2601 = vmatprep.mubr.bf16.mxu0 %v1367_v0  ;;  %2642 = vmatprep.mubr.bf16.mxu1 %v1369_v1 }
 0x2a3   :  { %2602 = vmatmul.mubr.bf16.vlgmr.msra.gmra.mrb[24].mxu0 %v1366_v62  ;;  %2643 = vmatmul.mubr.bf16.vlgmr.msra.gmra.mrb[24].mxu1 %v1368_v63 }
 0x2a4   :  { %3147 = vmatpush3.bf16.msra.mxu0 %v3298_v2  ;;  %3169 = vmatpush3.bf16.msra.mxu1 %v3299_v3  ;;  %v2885_v2 = vld [vmem:[%s3668_s7] ss:$0 sm:$0xff]  ;;  %s3441_s7 = smov [#allocation10]  }
 0x2a5   :  { %3148 = vmatprep.subr.bf16.mxu0 %v3300_v5  ;;  %3170 = vmatprep.subr.bf16.mxu1 %v3301_v6  ;;  %s2742_s25 = sshll.u32 %s3441_s7, 4  ;;  %s2743_s25 = int_to_ptr.vmem [resolvable:$true] %s2742_s25 }
 0x2a6   :  { %s3404_s26 = scalar_lea.vmem %s2743_s25, 256  ;;  %p3409_p11 = scmp.lt.s32.totalorder %s2743_s25, %s2743_s25 }
 0x2a7   :  { %p3405_p10 = scmp.ne.s32.totalorder %s2743_s25, %s3404_s26  ;;  %p3410_p12 = scmp.lt.s32.totalorder %s3404_s26, %s3404_s26 }
 0x2a8   :  { %3149 = vmatpush3.bf16.msra.mxu0 %v3302_v7  ;;  %3171 = vmatpush3.bf16.msra.mxu1 %v3303_v13 }
 0x2a9   :  { %3150 = vmatprep.subr.bf16.mxu0 %v3304_v14  ;;  %3172 = vmatprep.subr.bf16.mxu1 %v3305_v21  ;;  %p3411_p13 = por %p3410_p12, %p3409_p11 }
 0x2ab   :  { %p3412_p0 = pnand %p3411_p13, %p3405_p10 }
 0x2ac   :  { %3151 = vmatpush3.bf16.msra.mxu0 %v3306_v22  ;;  %3173 = vmatpush3.bf16.msra.mxu1 %v3307_v23 }
 0x2ad   :  { %3152 = vmatprep.subr.bf16.mxu0 %v3308_v24  ;;  %3174 = vmatprep.subr.bf16.mxu1 %v3309_v25 }
 0x2b0   :  { %3153 = vmatpush3.bf16.msra.mxu0 %v3310_v26  ;;  %3175 = vmatpush3.bf16.msra.mxu1 %v3311_v27 }
 0x2b1   :  { %3154 = vmatprep.subr.bf16.mxu0 %v3312_v29  ;;  %3176 = vmatprep.subr.bf16.mxu1 %v3313_v30 }
 0x2b4   :  { %3155 = vmatpush3.bf16.msra.mxu0 %v3314_v31  ;;  %3177 = vmatpush3.bf16.msra.mxu1 %v3315_v32 }
 0x2b5   :  { %3156 = vmatprep.subr.bf16.mxu0 %v3316_v33  ;;  %3178 = vmatprep.subr.bf16.mxu1 %v3317_v34 }
 0x2b8   :  { %v1274_v18 = vpop.f32.mrb[12].mxu0  ;;  %v1317_v15 = vpop.f32.mrb[12].mxu1  ;;  %3157 = vmatpush3.bf16.msra.mxu0 %v3318_v35  ;;  %3179 = vmatpush3.bf16.msra.mxu1 %v3319_v36 }
 0x2b9   :  { %v1275_v43 = vadd.f32 %v1274_v18, %v313_v37  ;;  %v1318_v44 = vadd.f32 %v1317_v15, %v321_v38  ;;  %v1276_v19 = vpop.f32.mrb[13].mxu0  ;;  %v1319_v10 = vpop.f32.mrb[13].mxu1  ;;  %3158 = vmatprep.subr.bf16.mxu0 %v3320_v39  ;;  %3180 = vmatprep.subr.bf16.mxu1 %v3321_v17 }
 0x2ba   :  { %v1277_v47 = vadd.f32 %v1276_v19, %v317_v40  ;;  %v1320_v11 = vadd.f32 %v1319_v10, %v325_v41  ;;  %v1278_v20 = vpop.f32.mrb[14].mxu0  ;;  %v1321_v16 = vpop.f32.mrb[14].mxu1 }
 0x2bb   :  { %v1279_v48 = vadd.f32 %v1278_v20, %v313_v37  ;;  %v1322_v12 = vadd.f32 %v1321_v16, %v321_v38  ;;  %v1280_v28 = vpop.f32.mrb[15].mxu0  ;;  %v1323_v49 = vpop.f32.mrb[15].mxu1  ;;  %v1338_v54 = vmax.f32 %v1275_v43, 0.0  ;;  %v1340_v55 = vmax.f32 %v1318_v44, 0.0 }
 0x2bc   :  { %v1281_v50 = vadd.f32 %v1280_v28, %v317_v40  ;;  %v1324_v51 = vadd.f32 %v1323_v49, %v325_v41  ;;  %3159 = vmatpush3.bf16.msra.mxu0 %v3322_v42  ;;  %3181 = vmatpush3.bf16.msra.mxu1 %v3323_v9  ;;  %v1339_v57 = vmax.f32 %v1277_v47, 0.0  ;;  %v1341_v4 = vmax.f32 %v1320_v11, 0.0 }
 0x2bd   :  { %v1354_v56 = vmax.f32 %v1279_v48, 0.0  ;;  %v1356_v8 = vmax.f32 %v1322_v12, 0.0  ;;  %3160 = vmatprep.subr.bf16.mxu0 %v3324_v45  ;;  %3182 = vmatprep.subr.bf16.mxu1 %v3325_v46 }
 0x2be   :  { %v1355_v58 = vmax.f32 %v1281_v50, 0.0  ;;  %v1357_v59 = vmax.f32 %v1324_v51, 0.0 }
 0x2bf   :  { %v1370_v60 = vpack.c.bf16 %v1354_v56, %v1338_v54  ;;  %v1372_v61 = vpack.c.bf16 %v1356_v8, %v1340_v55 }
 0x2c0   :  { %v1371_v62 = vpack.c.bf16 %v1355_v58, %v1339_v57  ;;  %v1373_v63 = vpack.c.bf16 %v1357_v59, %v1341_v4  ;;  %3161 = vmatpush3.bf16.msra.mxu0 %v3326_v52  ;;  %3183 = vmatpush3.bf16.msra.mxu1 %v3327_v53 }
 0x2c2   :  { %2683 = vmatprep.mubr.bf16.mxu0 %v1371_v62  ;;  %2724 = vmatprep.mubr.bf16.mxu1 %v1373_v63 }
 0x2c3   :  { %2684 = vmatmul.mubr.bf16.vlgmr.msra.gmra.mrb[28].mxu0 %v1370_v60  ;;  %2725 = vmatmul.mubr.bf16.vlgmr.msra.gmra.mrb[28].mxu1 %v1372_v61 }
 0x336   :  { %v3030_v0 = vpop.f32.mrb[16].mxu0  ;;  %v3052_v1 = vpop.f32.mrb[16].mxu1 }
 0x337   :  { %v3031_v3 = vpop.f32.mrb[17].mxu0  ;;  %v3053_v5 = vpop.f32.mrb[17].mxu1 }
 0x338   :  { %v3032_v6 = vadd.f32 %v3031_v3, %v3030_v0  ;;  %v3054_v7 = vadd.f32 %v3053_v5, %v3052_v1  ;;  %v3033_v13 = vpop.f32.mrb[18].mxu0  ;;  %v3055_v14 = vpop.f32.mrb[18].mxu1  ;;  %v3336_v0 = vld [vmem:[#allocation4] sm:$0xff]  ;;  %v3337_v3 = vld [vmem:[#allocation4 + $0x8] sm:$0xff] }
 0x339   :  { %v3034_v21 = vpop.f32.mrb[19].mxu0  ;;  %v3056_v22 = vpop.f32.mrb[19].mxu1 }
 0x33a   :  { %v2440_v23 = vadd.f32 %v3032_v6, %v2885_v2  ;;  %v3035_v24 = vadd.f32 %v3034_v21, %v3033_v13  ;;  %v3057_v25 = vadd.f32 %v3056_v22, %v3055_v14 }
 0x33c   :  { %v2481_v26 = vadd.f32 %v3054_v7, %v2440_v23  ;;  %v2443_v27 = vadd.f32 %v3035_v24, %v2885_v2 }
 0x33e   :  { %v2484_v29 = vadd.f32 %v3057_v25, %v2443_v27 }
 0x356   :  { %v3074_v30 = vpop.f32.mrb[20].mxu0  ;;  %v3096_v31 = vpop.f32.mrb[20].mxu1 }
 0x357   :  { %v3075_v32 = vpop.f32.mrb[21].mxu0  ;;  %v3097_v33 = vpop.f32.mrb[21].mxu1 }
 0x358   :  { %v3076_v34 = vadd.f32 %v3075_v32, %v3074_v30  ;;  %v3098_v35 = vadd.f32 %v3097_v33, %v3096_v31  ;;  %v3077_v36 = vpop.f32.mrb[22].mxu0  ;;  %v3099_v37 = vpop.f32.mrb[22].mxu1 }
 0x359   :  { %v3078_v38 = vpop.f32.mrb[23].mxu0  ;;  %v3100_v39 = vpop.f32.mrb[23].mxu1 }
 0x35a   :  { %v2522_v17 = vadd.f32 %v3076_v34, %v2481_v26  ;;  %v3079_v40 = vadd.f32 %v3078_v38, %v3077_v36  ;;  %v3101_v41 = vadd.f32 %v3100_v39, %v3099_v37 }
 0x35c   :  { %v2563_v18 = vadd.f32 %v3098_v35, %v2522_v17  ;;  %v2525_v15 = vadd.f32 %v3079_v40, %v2484_v29 }
 0x35e   :  { %v2566_v42 = vadd.f32 %v3101_v41, %v2525_v15 }
 0x376   :  { %v3118_v9 = vpop.f32.mrb[24].mxu0  ;;  %v3140_v43 = vpop.f32.mrb[24].mxu1 }
 0x377   :  { %v3119_v44 = vpop.f32.mrb[25].mxu0  ;;  %v3141_v19 = vpop.f32.mrb[25].mxu1 }
 0x378   :  { %v3120_v10 = vadd.f32 %v3119_v44, %v3118_v9  ;;  %v3142_v45 = vadd.f32 %v3141_v19, %v3140_v43  ;;  %v3121_v46 = vpop.f32.mrb[26].mxu0  ;;  %v3143_v47 = vpop.f32.mrb[26].mxu1 }
 0x379   :  { %v3122_v11 = vpop.f32.mrb[27].mxu0  ;;  %v3144_v20 = vpop.f32.mrb[27].mxu1 }
 0x37a   :  { %v2604_v16 = vadd.f32 %v3120_v10, %v2563_v18  ;;  %v3123_v48 = vadd.f32 %v3122_v11, %v3121_v46  ;;  %v3145_v12 = vadd.f32 %v3144_v20, %v3143_v47 }
 0x37c   :  { %v2645_v28 = vadd.f32 %v3142_v45, %v2604_v16  ;;  %v2607_v49 = vadd.f32 %v3123_v48, %v2566_v42 }
 0x37e   :  { %v2648_v50 = vadd.f32 %v3145_v12, %v2607_v49 }
 0x396   :  { %v3162_v51 = vpop.f32.mrb[28].mxu0  ;;  %v3184_v52 = vpop.f32.mrb[28].mxu1 }
 0x397   :  { %v3163_v53 = vpop.f32.mrb[29].mxu0  ;;  %v3185_v54 = vpop.f32.mrb[29].mxu1 }
 0x398   :  { %v3164_v55 = vadd.f32 %v3163_v53, %v3162_v51  ;;  %v3186_v56 = vadd.f32 %v3185_v54, %v3184_v52  ;;  %v3165_v8 = vpop.f32.mrb[30].mxu0  ;;  %v3187_v57 = vpop.f32.mrb[30].mxu1 }
 0x399   :  { %v3166_v4 = vpop.f32.mrb[31].mxu0  ;;  %v3188_v58 = vpop.f32.mrb[31].mxu1 }
 0x39a   :  { %v2686_v59 = vadd.f32 %v3164_v55, %v2645_v28  ;;  %v3167_v60 = vadd.f32 %v3166_v4, %v3165_v8  ;;  %v3189_v61 = vadd.f32 %v3188_v58, %v3187_v57 }
 0x39c   :  { %v2727_v62 = vadd.f32 %v3186_v56, %v2686_v59  ;;  %v2689_v63 = vadd.f32 %v3167_v60, %v2648_v50 }
 0x39e   :  { %v2733_v1 = vadd.f32 %v3336_v0, %v2727_v62  ;;  %v2730_v2 = vadd.f32 %v3189_v61, %v2689_v63 }
 0x3a0   :  { %2735 = vst [vmem:[#allocation10] sm:$0xff] %v2733_v1  ;;  %v2734_v5 = vadd.f32 %v3337_v3, %v2730_v2 }
 0x3a2   :  { %2736 = vst [vmem:[#allocation10 + $0x8] sm:$0xff] %v2734_v5 }
 0x3a3   :  { %3415 = shalt.err (!%p3412_p0)
}
 0x3a4   :  { %s3416_s30 = scalar_lea.hbm %s3669_s8, 256 }
 0x3a5   :  { %p3417_p1 = scmp.ne.s32.totalorder %s3669_s8, %s3416_s30  ;;  %p3420_p2 = scmp.lt.u32.totalorder %s3416_s30, %s3669_s8 }
 0x3a7   :  { %p3422_p3 = pnand %p3420_p2, %p3417_p1 }
 0x3a9   :  { %3425 = shalt.err (!%p3422_p3)
}
 0x3aa   :  { %2748 = dma.vmem_to_hbm [thread:$0]  %s2743_s25, 256, %s3669_s8, [#allocation6], %s3436_s4, %s3436_s4, %s3437_s27  }
 0x3ab   :  { %3430 = dma.done.wait [#allocation6], 256  }
 0x3ac   :  { %3431 = vsyncadd [#allocation6], 4294967040 }
 0x3ad   :  { %2752 = vsyncpa [#allocation5], 1 }
 0x3ae   :  { %2753 = vsyncpa [#allocation8], 1 }
 0x3af   :  { %2754 = vsyncpa [#allocation6], 1 }

</bundles_post_ra>
